<compile_context>
chip_gen: v7x
topology: tpu7x:2x2x1
jax: 0.10.0
libtpu: 0.0.40
codegen_flags: <defaults>
</compile_context>

<pallas_src>
import functools

import jax
import jax.numpy as jnp
from jax.experimental import pallas as pl
from jax.experimental.pallas import tpu as pltpu

LN_EPS = 1e-5  # torch.nn.LayerNorm default


def _layer_norm(x, g, b):
    mu = jnp.mean(x, axis=-1, keepdims=True)
    var = jnp.mean(jnp.square(x - mu), axis=-1, keepdims=True)
    return (x - mu) * jax.lax.rsqrt(var + LN_EPS) * g + b


# ---------------------------------------------------------------------------
# Single fused kernel: full transformer stack + final LN/logits + averager,
# one batch element per grid step.
# ---------------------------------------------------------------------------
def _fused_forward_kernel(
        x_ref, bias_ref, avgm_ref,
        aln_g_ref, aln_b_ref, wqkv_ref, wo_ref,
        fln_g_ref, fln_b_ref, w1_ref, b1_ref, w2_ref, b2_ref,
        fng_ref, fnb_ref, wl_ref, bl_ref, wa_ref, ba_ref,
        tok_ref, emb_ref, alpha_ref,
        *, n_layers, heads, dim_head):
    x = x_ref[0].astype(jnp.float32)          # (T, D)
    bias = bias_ref[0]                        # (1, T): 0 valid / -1e9 pad (key mask)
    inner = heads * dim_head
    scale = dim_head ** -0.5

    for l in range(n_layers):                 # static unroll; weights VMEM-resident
        # ---- pre-LN multi-head self-attention + residual ----
        xn = _layer_norm(x, aln_g_ref[l], aln_b_ref[l])
        # Fused QKV projection: one MXU push with N = 3*inner.
        qkv = jnp.dot(xn, wqkv_ref[l], preferred_element_type=jnp.float32)  # (T, 3*inner)

        def heads_of(base):                   # -> (heads, T, dim_head)
            return jnp.stack(
                [qkv[:, base + h * dim_head: base + (h + 1) * dim_head]
                 for h in range(heads)], axis=0)

        q = heads_of(0)
        k = heads_of(inner)
        v = heads_of(2 * inner)

        # Head-batched scores and P@V (single batched dot_general each).
        s = jax.lax.dot_general(q, k, (((2,), (2,)), ((0,), (0,))),
                                preferred_element_type=jnp.float32)          # (H, T, T)
        s = s * scale + bias[None]                                           # key padding
        s = s - jnp.max(s, axis=-1, keepdims=True)
        p = jnp.exp(s)
        p = p * pl.reciprocal(jnp.sum(p, axis=-1, keepdims=True), approx=True)
        oh = jax.lax.dot_general(p, v, (((2,), (1,)), ((0,), (0,))),
                                 preferred_element_type=jnp.float32)         # (H, T, dh)
        # Output projection with per-head-stacked Wo, head-batched, reduced over heads
        # (== concat_h(oh) @ Wo, without a lane-dim concatenate).
        proj = jax.lax.dot_general(oh, wo_ref[l], (((2,), (1,)), ((0,), (0,))),
                                   preferred_element_type=jnp.float32)       # (H, T, D)
        x = x + jnp.sum(proj, axis=0)                                        # residual

        # ---- pre-LN feed-forward (GELU) + residual ----
        yn = _layer_norm(x, fln_g_ref[l], fln_b_ref[l])
        h1 = jnp.dot(yn, w1_ref[l], preferred_element_type=jnp.float32) + b1_ref[l]
        # TODO(synk): x-transformers FF uses exact erf-GELU; tanh-approx GELU used
        # here for Mosaic-safe lowering (tiny numerical difference).
        h1 = jax.nn.gelu(h1, approximate=True)
        x = x + jnp.dot(h1, w2_ref[l], preferred_element_type=jnp.float32) + b2_ref[l]

    # ---- final LayerNorm + to_logits Linear(D -> D) == BACKBONE_TOKENS ----
    xn = _layer_norm(x, fng_ref[...], fnb_ref[...])
    tokens = jnp.dot(xn, wl_ref[...], preferred_element_type=jnp.float32) + bl_ref[...]
    tok_ref[0] = tokens.astype(tok_ref.dtype)

    # ---- AttentionAverager (lane-dense: sequence axis kept in lanes) ----
    s_row = jax.lax.dot_general(wa_ref[...], tokens, (((1,), (1,)), ((), ())),
                                preferred_element_type=jnp.float32)          # (1, T)
    s_row = jnp.tanh(s_row + ba_ref[...])
    s_row = s_row + avgm_ref[0]               # bool mask promoted to {0,1} (as in ref)
    s_row = s_row - jnp.max(s_row, axis=-1, keepdims=True)
    p_row = jnp.exp(s_row)
    alpha = p_row * pl.reciprocal(jnp.sum(p_row, axis=-1, keepdims=True), approx=True)
    emb = jnp.dot(alpha, tokens, preferred_element_type=jnp.float32)         # (1, D)
    emb_ref[0] = emb.astype(emb_ref.dtype)
    alpha_ref[0] = alpha.astype(alpha_ref.dtype)


def fused_forward(x, attn_bias, avg_mask, params, *, heads, dim_head):
    B, T, D = x.shape
    L = params["wqkv"].shape[0]

    def full(a):                                   # full-array, grid-invariant block
        n = a.ndim
        return pl.BlockSpec(a.shape, lambda b, n=n: (0,) * n)

    kern = functools.partial(_fused_forward_kernel,
                             n_layers=L, heads=heads, dim_head=dim_head)
    return pl.pallas_call(
        kern,
        out_shape=(jax.ShapeDtypeStruct((B, T, D), x.dtype),   # BACKBONE_TOKENS
                   jax.ShapeDtypeStruct((B, 1, D), x.dtype),   # embedding
                   jax.ShapeDtypeStruct((B, 1, T), x.dtype)),  # alpha (lane-dense)
        grid=(B,),
        in_specs=[
            pl.BlockSpec((1, T, D), lambda b: (b, 0, 0)),      # x
            pl.BlockSpec((1, 1, T), lambda b: (b, 0, 0)),      # attention key bias
            pl.BlockSpec((1, 1, T), lambda b: (b, 0, 0)),      # averager mask {0,1}
            full(params["attn_ln_g"]), full(params["attn_ln_b"]),
            full(params["wqkv"]), full(params["wo"]),
            full(params["ff_ln_g"]), full(params["ff_ln_b"]),
            full(params["w1"]), full(params["b1"]),
            full(params["w2"]), full(params["b2"]),
            full(params["final_ln_g"]), full(params["final_ln_b"]),
            full(params["w_logits"]), full(params["b_logits"]),
            full(params["w_avg"]), full(params["b_avg"]),
        ],
        out_specs=(pl.BlockSpec((1, T, D), lambda b: (b, 0, 0)),
                   pl.BlockSpec((1, 1, D), lambda b: (b, 0, 0)),
                   pl.BlockSpec((1, 1, T), lambda b: (b, 0, 0))),
        compiler_params=pltpu.CompilerParams(dimension_semantics=("parallel",)),
    )(x, attn_bias, avg_mask,
      params["attn_ln_g"], params["attn_ln_b"], params["wqkv"], params["wo"],
      params["ff_ln_g"], params["ff_ln_b"], params["w1"], params["b1"],
      params["w2"], params["b2"],
      params["final_ln_g"], params["final_ln_b"],
      params["w_logits"], params["b_logits"],
      params["w_avg"], params["b_avg"])


# ---------------------------------------------------------------------------
# Parameter init (deterministic, synthetic, layer-stacked) and full forward.
# ---------------------------------------------------------------------------
def init_params(key, *, D, heads, dim_head, n_layers, ff_mult=4):
    inner = heads * dim_head
    hidden = ff_mult * D
    keys = jax.random.split(key, 6)

    def w(k, shape, scale=0.02):
        return (scale * jax.random.normal(k, shape)).astype(jnp.float32)

    ones = lambda s: jnp.ones(s, jnp.float32)
    zeros = lambda s: jnp.zeros(s, jnp.float32)

    return dict(
        attn_ln_g=ones((n_layers, 1, D)), attn_ln_b=zeros((n_layers, 1, D)),
        # fused QKV: columns laid out as [q_h0..q_h{H-1} | k_h0.. | v_h0..]
        wqkv=w(keys[0], (n_layers, D, 3 * inner)),
        # output projection stacked per head: (L, heads, dim_head, D)
        wo=w(keys[1], (n_layers, heads, dim_head, D)),
        ff_ln_g=ones((n_layers, 1, D)), ff_ln_b=zeros((n_layers, 1, D)),
        w1=w(keys[2], (n_layers, D, hidden)), b1=zeros((n_layers, 1, hidden)),
        w2=w(keys[3], (n_layers, hidden, D)), b2=zeros((n_layers, 1, D)),
        final_ln_g=ones((1, D)), final_ln_b=zeros((1, D)),
        w_logits=w(keys[4], (D, D)), b_logits=zeros((1, D)),
        w_avg=w(keys[5], (1, D)), b_avg=zeros((1, 1)),
    )


@functools.partial(jax.jit, static_argnames=("heads", "dim_head"))
def model_forward(params, input_data, mask, *, heads, dim_head):
    # input_data: (B, token_dim=D, T) as in the PyTorch batch; mask: (B, T) bool, True=valid.
    # The (B,D,T)->(B,T,D) transpose stays in plain JAX glue; negligible at these sizes.
    x = jnp.transpose(input_data, (0, 2, 1)).astype(jnp.float32)             # (B, T, D)
    attn_bias = jnp.where(mask, 0.0, -1e9).astype(jnp.float32)[:, None, :]   # (B, 1, T)
    avg_mask = mask.astype(jnp.float32)[:, None, :]                          # (B, 1, T)
    tokens, emb, alpha_row = fused_forward(x, attn_bias, avg_mask, params,
                                           heads=heads, dim_head=dim_head)
    alpha = jnp.transpose(alpha_row, (0, 2, 1))      # (B, T, 1), PyTorch alpha shape
    return tokens, emb[:, 0, :], alpha               # BACKBONE_TOKENS, BACKBONE_EMBEDDINGS, alpha


if __name__ == "__main__":
    B, T, D = 2, 8, 32            # batch, max_seq_len, token_dim
    heads, dim_head, n_layers = 4, 64, 2

    key = jax.random.PRNGKey(0)
    kp, kx = jax.random.split(key)
    params = init_params(kp, D=D, heads=heads, dim_head=dim_head, n_layers=n_layers)

    input_data = jax.random.normal(kx, (B, D, T), jnp.float32)     # [B, token_dim, T]
    lengths = jnp.array([T, 5])
    mask = jnp.arange(T)[None, :] < lengths[:, None]               # (B, T) bool

    tokens, emb, alpha = model_forward(params, input_data, mask,
                                       heads=heads, dim_head=dim_head)
    jax.block_until_ready((tokens, emb, alpha))

    assert tokens.shape == (B, T, D)
    assert emb.shape == (B, D)
    assert alpha.shape == (B, T, 1)
    assert bool(jnp.all(jnp.isfinite(tokens))) and bool(jnp.all(jnp.isfinite(emb)))
    assert bool(jnp.all(jnp.isfinite(alpha)))
    print("KERNEL_OK")
</pallas_src>

<mosaic_0001>
module attributes {stable_mosaic.version = 11 : i64} {
  func.func @_fused_forward_kernel(%arg0: i32, %arg1: memref<1x8x32xf32, #tpu.memory_space<vmem>>, %arg2: memref<1x1x8xf32, #tpu.memory_space<vmem>>, %arg3: memref<1x1x8xf32, #tpu.memory_space<vmem>>, %arg4: memref<2x1x32xf32, #tpu.memory_space<vmem>>, %arg5: memref<2x1x32xf32, #tpu.memory_space<vmem>>, %arg6: memref<2x32x768xf32, #tpu.memory_space<vmem>>, %arg7: memref<2x4x64x32xf32, #tpu.memory_space<vmem>>, %arg8: memref<2x1x32xf32, #tpu.memory_space<vmem>>, %arg9: memref<2x1x32xf32, #tpu.memory_space<vmem>>, %arg10: memref<2x32x128xf32, #tpu.memory_space<vmem>>, %arg11: memref<2x1x128xf32, #tpu.memory_space<vmem>>, %arg12: memref<2x128x32xf32, #tpu.memory_space<vmem>>, %arg13: memref<2x1x32xf32, #tpu.memory_space<vmem>>, %arg14: memref<1x32xf32, #tpu.memory_space<vmem>>, %arg15: memref<1x32xf32, #tpu.memory_space<vmem>>, %arg16: memref<32x32xf32, #tpu.memory_space<vmem>>, %arg17: memref<1x32xf32, #tpu.memory_space<vmem>>, %arg18: memref<1x32xf32, #tpu.memory_space<vmem>>, %arg19: memref<1x1xf32, #tpu.memory_space<vmem>>, %arg20: memref<1x8x32xf32, #tpu.memory_space<vmem>>, %arg21: memref<1x1x32xf32, #tpu.memory_space<vmem>>, %arg22: memref<1x1x8xf32, #tpu.memory_space<vmem>>) attributes {dimension_semantics = [#tpu.dimension_semantics<parallel>], iteration_bounds = array<i64: 2>, scalar_prefetch = 0 : i64, scratch_operands = 0 : i64, tpu.core_type = #tpu.core_type<tc>, window_params = [{transform_indices = @transform_0, window_bounds = array<i64: 1, 8, 32>}, {transform_indices = @transform_1, window_bounds = array<i64: 1, 1, 8>}, {transform_indices = @transform_2, window_bounds = array<i64: 1, 1, 8>}, {pipeline_mode = #tpu.pipeline_mode<synchronous>, transform_indices = @transform_3, window_bounds = array<i64: 2, 1, 32>}, {pipeline_mode = #tpu.pipeline_mode<synchronous>, transform_indices = @transform_4, window_bounds = array<i64: 2, 1, 32>}, {pipeline_mode = #tpu.pipeline_mode<synchronous>, transform_indices = @transform_5, window_bounds = array<i64: 2, 32, 768>}, {pipeline_mode = #tpu.pipeline_mode<synchronous>, transform_indices = @transform_6, window_bounds = array<i64: 2, 4, 64, 32>}, {pipeline_mode = #tpu.pipeline_mode<synchronous>, transform_indices = @transform_7, window_bounds = array<i64: 2, 1, 32>}, {pipeline_mode = #tpu.pipeline_mode<synchronous>, transform_indices = @transform_8, window_bounds = array<i64: 2, 1, 32>}, {pipeline_mode = #tpu.pipeline_mode<synchronous>, transform_indices = @transform_9, window_bounds = array<i64: 2, 32, 128>}, {pipeline_mode = #tpu.pipeline_mode<synchronous>, transform_indices = @transform_10, window_bounds = array<i64: 2, 1, 128>}, {pipeline_mode = #tpu.pipeline_mode<synchronous>, transform_indices = @transform_11, window_bounds = array<i64: 2, 128, 32>}, {pipeline_mode = #tpu.pipeline_mode<synchronous>, transform_indices = @transform_12, window_bounds = array<i64: 2, 1, 32>}, {pipeline_mode = #tpu.pipeline_mode<synchronous>, transform_indices = @transform_13, window_bounds = array<i64: 1, 32>}, {pipeline_mode = #tpu.pipeline_mode<synchronous>, transform_indices = @transform_14, window_bounds = array<i64: 1, 32>}, {pipeline_mode = #tpu.pipeline_mode<synchronous>, transform_indices = @transform_15, window_bounds = array<i64: 32, 32>}, {pipeline_mode = #tpu.pipeline_mode<synchronous>, transform_indices = @transform_16, window_bounds = array<i64: 1, 32>}, {pipeline_mode = #tpu.pipeline_mode<synchronous>, transform_indices = @transform_17, window_bounds = array<i64: 1, 32>}, {pipeline_mode = #tpu.pipeline_mode<synchronous>, transform_indices = @transform_18, window_bounds = array<i64: 1, 1>}, {transform_indices = @transform_19, window_bounds = array<i64: 1, 8, 32>}, {transform_indices = @transform_20, window_bounds = array<i64: 1, 1, 32>}, {transform_indices = @transform_21, window_bounds = array<i64: 1, 1, 8>}]} {
    %c0 = arith.constant 0 : index
    %c0_0 = arith.constant 0 : index
    %c0_1 = arith.constant 0 : index
    %0 = vector.load %arg1[%c0, %c0_0, %c0_1] : memref<1x8x32xf32, #tpu.memory_space<vmem>>, vector<1x8x32xf32>
    %1 = vector.shape_cast %0 : vector<1x8x32xf32> to vector<8x32xf32>
    %c0_2 = arith.constant 0 : index
    %c0_3 = arith.constant 0 : index
    %c0_4 = arith.constant 0 : index
    %2 = vector.load %arg2[%c0_2, %c0_3, %c0_4] : memref<1x1x8xf32, #tpu.memory_space<vmem>>, vector<1x1x8xf32>
    %3 = vector.shape_cast %2 : vector<1x1x8xf32> to vector<1x8xf32>
    %c0_5 = arith.constant 0 : index
    %c0_6 = arith.constant 0 : index
    %c0_7 = arith.constant 0 : index
    %4 = vector.load %arg4[%c0_5, %c0_6, %c0_7] : memref<2x1x32xf32, #tpu.memory_space<vmem>>, vector<1x1x32xf32>
    %5 = vector.shape_cast %4 : vector<1x1x32xf32> to vector<1x32xf32>
    %c0_8 = arith.constant 0 : index
    %c0_9 = arith.constant 0 : index
    %c0_10 = arith.constant 0 : index
    %6 = vector.load %arg5[%c0_8, %c0_9, %c0_10] : memref<2x1x32xf32, #tpu.memory_space<vmem>>, vector<1x1x32xf32>
    %7 = vector.shape_cast %6 : vector<1x1x32xf32> to vector<1x32xf32>
    %cst = arith.constant dense<0.000000e+00> : vector<8xf32>
    %8 = vector.multi_reduction <add>, %1, %cst [1] : vector<8x32xf32> to vector<8xf32>
    %9 = vector.shape_cast %8 : vector<8xf32> to vector<8x1xf32>
    %cst_11 = arith.constant 3.200000e+01 : f32
    %10 = vector.broadcast %cst_11 : f32 to vector<8x1xf32>
    %11 = arith.divf %9, %10 : vector<8x1xf32>
    %12 = vector.broadcast %11 : vector<8x1xf32> to vector<8x32xf32>
    %13 = arith.subf %1, %12 : vector<8x32xf32>
    %14 = arith.mulf %13, %13 : vector<8x32xf32>
    %cst_12 = arith.constant dense<0.000000e+00> : vector<8xf32>
    %15 = vector.multi_reduction <add>, %14, %cst_12 [1] : vector<8x32xf32> to vector<8xf32>
    %16 = vector.shape_cast %15 : vector<8xf32> to vector<8x1xf32>
    %cst_13 = arith.constant 3.200000e+01 : f32
    %17 = vector.broadcast %cst_13 : f32 to vector<8x1xf32>
    %18 = arith.divf %16, %17 : vector<8x1xf32>
    %19 = vector.broadcast %11 : vector<8x1xf32> to vector<8x32xf32>
    %20 = arith.subf %1, %19 : vector<8x32xf32>
    %cst_14 = arith.constant 9.99999974E-6 : f32
    %21 = vector.broadcast %cst_14 : f32 to vector<8x1xf32>
    %22 = arith.addf %18, %21 : vector<8x1xf32>
    %23 = math.rsqrt %22 : vector<8x1xf32>
    %24 = vector.broadcast %23 : vector<8x1xf32> to vector<8x32xf32>
    %25 = arith.mulf %20, %24 : vector<8x32xf32>
    %26 = vector.broadcast %5 : vector<1x32xf32> to vector<8x32xf32>
    %27 = arith.mulf %25, %26 : vector<8x32xf32>
    %28 = vector.broadcast %7 : vector<1x32xf32> to vector<8x32xf32>
    %29 = arith.addf %27, %28 : vector<8x32xf32>
    %c0_15 = arith.constant 0 : index
    %c0_16 = arith.constant 0 : index
    %c0_17 = arith.constant 0 : index
    %30 = vector.load %arg6[%c0_15, %c0_16, %c0_17] : memref<2x32x768xf32, #tpu.memory_space<vmem>>, vector<1x32x768xf32>
    %31 = vector.shape_cast %30 : vector<1x32x768xf32> to vector<32x768xf32>
    %cst_18 = arith.constant dense<0.000000e+00> : vector<8x768xf32>
    %32 = tpu.matmul %29, %31, %cst_18 {dimension_numbers = #tpu.dot_dimension_numbers<[1], [0], [0], [1], [0, 0, 1, 1], [], []>} : vector<8x32xf32>, vector<32x768xf32>, vector<8x768xf32> -> vector<8x768xf32>
    %33 = vector.extract_strided_slice %32 {offsets = [0, 0], sizes = [8, 64], strides = [1, 1]} : vector<8x768xf32> to vector<8x64xf32>
    %34 = vector.extract_strided_slice %32 {offsets = [0, 64], sizes = [8, 64], strides = [1, 1]} : vector<8x768xf32> to vector<8x64xf32>
    %35 = vector.extract_strided_slice %32 {offsets = [0, 128], sizes = [8, 64], strides = [1, 1]} : vector<8x768xf32> to vector<8x64xf32>
    %36 = vector.extract_strided_slice %32 {offsets = [0, 192], sizes = [8, 64], strides = [1, 1]} : vector<8x768xf32> to vector<8x64xf32>
    %37 = vector.shape_cast %33 : vector<8x64xf32> to vector<1x8x64xf32>
    %38 = vector.shape_cast %34 : vector<8x64xf32> to vector<1x8x64xf32>
    %39 = vector.shape_cast %35 : vector<8x64xf32> to vector<1x8x64xf32>
    %40 = vector.shape_cast %36 : vector<8x64xf32> to vector<1x8x64xf32>
    %41 = tpu.concatenate %37, %38, %39, %40 in 0 : vector<1x8x64xf32>, vector<1x8x64xf32>, vector<1x8x64xf32>, vector<1x8x64xf32> -> vector<4x8x64xf32>
    %42 = vector.extract_strided_slice %32 {offsets = [0, 256], sizes = [8, 64], strides = [1, 1]} : vector<8x768xf32> to vector<8x64xf32>
    %43 = vector.extract_strided_slice %32 {offsets = [0, 320], sizes = [8, 64], strides = [1, 1]} : vector<8x768xf32> to vector<8x64xf32>
    %44 = vector.extract_strided_slice %32 {offsets = [0, 384], sizes = [8, 64], strides = [1, 1]} : vector<8x768xf32> to vector<8x64xf32>
    %45 = vector.extract_strided_slice %32 {offsets = [0, 448], sizes = [8, 64], strides = [1, 1]} : vector<8x768xf32> to vector<8x64xf32>
    %46 = vector.shape_cast %42 : vector<8x64xf32> to vector<1x8x64xf32>
    %47 = vector.shape_cast %43 : vector<8x64xf32> to vector<1x8x64xf32>
    %48 = vector.shape_cast %44 : vector<8x64xf32> to vector<1x8x64xf32>
    %49 = vector.shape_cast %45 : vector<8x64xf32> to vector<1x8x64xf32>
    %50 = tpu.concatenate %46, %47, %48, %49 in 0 : vector<1x8x64xf32>, vector<1x8x64xf32>, vector<1x8x64xf32>, vector<1x8x64xf32> -> vector<4x8x64xf32>
    %51 = vector.extract_strided_slice %32 {offsets = [0, 512], sizes = [8, 64], strides = [1, 1]} : vector<8x768xf32> to vector<8x64xf32>
    %52 = vector.extract_strided_slice %32 {offsets = [0, 576], sizes = [8, 64], strides = [1, 1]} : vector<8x768xf32> to vector<8x64xf32>
    %53 = vector.extract_strided_slice %32 {offsets = [0, 640], sizes = [8, 64], strides = [1, 1]} : vector<8x768xf32> to vector<8x64xf32>
    %54 = vector.extract_strided_slice %32 {offsets = [0, 704], sizes = [8, 64], strides = [1, 1]} : vector<8x768xf32> to vector<8x64xf32>
    %55 = vector.shape_cast %51 : vector<8x64xf32> to vector<1x8x64xf32>
    %56 = vector.shape_cast %52 : vector<8x64xf32> to vector<1x8x64xf32>
    %57 = vector.shape_cast %53 : vector<8x64xf32> to vector<1x8x64xf32>
    %58 = vector.shape_cast %54 : vector<8x64xf32> to vector<1x8x64xf32>
    %59 = tpu.concatenate %55, %56, %57, %58 in 0 : vector<1x8x64xf32>, vector<1x8x64xf32>, vector<1x8x64xf32>, vector<1x8x64xf32> -> vector<4x8x64xf32>
    %cst_19 = arith.constant dense<0.000000e+00> : vector<4x8x8xf32>
    %60 = tpu.matmul %41, %50, %cst_19 {dimension_numbers = #tpu.dot_dimension_numbers<[2], [2], [1], [1], [0, 0, 0, 1, 1, 1], [0], [0]>} : vector<4x8x64xf32>, vector<4x8x64xf32>, vector<4x8x8xf32> -> vector<4x8x8xf32>
    %cst_20 = arith.constant 1.250000e-01 : f32
    %61 = vector.broadcast %cst_20 : f32 to vector<4x8x8xf32>
    %62 = arith.mulf %60, %61 : vector<4x8x8xf32>
    %63 = vector.shape_cast %3 : vector<1x8xf32> to vector<1x1x8xf32>
    %64 = vector.broadcast %63 : vector<1x1x8xf32> to vector<4x8x8xf32>
    %65 = arith.addf %62, %64 : vector<4x8x8xf32>
    %cst_21 = arith.constant dense<0xFF800000> : vector<4x8xf32>
    %66 = vector.multi_reduction <maximumf>, %65, %cst_21 [2] : vector<4x8x8xf32> to vector<4x8xf32>
    %67 = vector.shape_cast %66 : vector<4x8xf32> to vector<4x8x1xf32>
    %68 = vector.broadcast %67 : vector<4x8x1xf32> to vector<4x8x8xf32>
    %69 = arith.subf %65, %68 : vector<4x8x8xf32>
    %70 = math.exp %69 : vector<4x8x8xf32>
    %cst_22 = arith.constant dense<0.000000e+00> : vector<4x8xf32>
    %71 = vector.multi_reduction <add>, %70, %cst_22 [2] : vector<4x8x8xf32> to vector<4x8xf32>
    %72 = vector.shape_cast %71 : vector<4x8xf32> to vector<4x8x1xf32>
    %73 = tpu.reciprocal %72 {approx = true} : vector<4x8x1xf32> -> vector<4x8x1xf32>
    %74 = vector.broadcast %73 : vector<4x8x1xf32> to vector<4x8x8xf32>
    %75 = arith.mulf %70, %74 : vector<4x8x8xf32>
    %cst_23 = arith.constant dense<0.000000e+00> : vector<4x8x64xf32>
    %76 = tpu.matmul %75, %59, %cst_23 {dimension_numbers = #tpu.dot_dimension_numbers<[2], [1], [1], [2], [0, 0, 0, 1, 1, 2], [0], [0]>} : vector<4x8x8xf32>, vector<4x8x64xf32>, vector<4x8x64xf32> -> vector<4x8x64xf32>
    %c0_24 = arith.constant 0 : index
    %c0_25 = arith.constant 0 : index
    %c0_26 = arith.constant 0 : index
    %c0_27 = arith.constant 0 : index
    %77 = vector.load %arg7[%c0_24, %c0_25, %c0_26, %c0_27] : memref<2x4x64x32xf32, #tpu.memory_space<vmem>>, vector<1x4x64x32xf32>
    %78 = vector.shape_cast %77 : vector<1x4x64x32xf32> to vector<4x64x32xf32>
    %cst_28 = arith.constant dense<0.000000e+00> : vector<4x8x32xf32>
    %79 = tpu.matmul %76, %78, %cst_28 {dimension_numbers = #tpu.dot_dimension_numbers<[2], [1], [1], [2], [0, 0, 0, 1, 1, 2], [0], [0]>} : vector<4x8x64xf32>, vector<4x64x32xf32>, vector<4x8x32xf32> -> vector<4x8x32xf32>
    %cst_29 = arith.constant dense<0.000000e+00> : vector<8x32xf32>
    %80 = vector.multi_reduction <add>, %79, %cst_29 [0] : vector<4x8x32xf32> to vector<8x32xf32>
    %81 = arith.addf %1, %80 : vector<8x32xf32>
    %c0_30 = arith.constant 0 : index
    %c0_31 = arith.constant 0 : index
    %c0_32 = arith.constant 0 : index
    %82 = vector.load %arg8[%c0_30, %c0_31, %c0_32] : memref<2x1x32xf32, #tpu.memory_space<vmem>>, vector<1x1x32xf32>
    %83 = vector.shape_cast %82 : vector<1x1x32xf32> to vector<1x32xf32>
    %c0_33 = arith.constant 0 : index
    %c0_34 = arith.constant 0 : index
    %c0_35 = arith.constant 0 : index
    %84 = vector.load %arg9[%c0_33, %c0_34, %c0_35] : memref<2x1x32xf32, #tpu.memory_space<vmem>>, vector<1x1x32xf32>
    %85 = vector.shape_cast %84 : vector<1x1x32xf32> to vector<1x32xf32>
    %cst_36 = arith.constant dense<0.000000e+00> : vector<8xf32>
    %86 = vector.multi_reduction <add>, %81, %cst_36 [1] : vector<8x32xf32> to vector<8xf32>
    %87 = vector.shape_cast %86 : vector<8xf32> to vector<8x1xf32>
    %cst_37 = arith.constant 3.200000e+01 : f32
    %88 = vector.broadcast %cst_37 : f32 to vector<8x1xf32>
    %89 = arith.divf %87, %88 : vector<8x1xf32>
    %90 = vector.broadcast %89 : vector<8x1xf32> to vector<8x32xf32>
    %91 = arith.subf %81, %90 : vector<8x32xf32>
    %92 = arith.mulf %91, %91 : vector<8x32xf32>
    %cst_38 = arith.constant dense<0.000000e+00> : vector<8xf32>
    %93 = vector.multi_reduction <add>, %92, %cst_38 [1] : vector<8x32xf32> to vector<8xf32>
    %94 = vector.shape_cast %93 : vector<8xf32> to vector<8x1xf32>
    %cst_39 = arith.constant 3.200000e+01 : f32
    %95 = vector.broadcast %cst_39 : f32 to vector<8x1xf32>
    %96 = arith.divf %94, %95 : vector<8x1xf32>
    %97 = vector.broadcast %89 : vector<8x1xf32> to vector<8x32xf32>
    %98 = arith.subf %81, %97 : vector<8x32xf32>
    %cst_40 = arith.constant 9.99999974E-6 : f32
    %99 = vector.broadcast %cst_40 : f32 to vector<8x1xf32>
    %100 = arith.addf %96, %99 : vector<8x1xf32>
    %101 = math.rsqrt %100 : vector<8x1xf32>
    %102 = vector.broadcast %101 : vector<8x1xf32> to vector<8x32xf32>
    %103 = arith.mulf %98, %102 : vector<8x32xf32>
    %104 = vector.broadcast %83 : vector<1x32xf32> to vector<8x32xf32>
    %105 = arith.mulf %103, %104 : vector<8x32xf32>
    %106 = vector.broadcast %85 : vector<1x32xf32> to vector<8x32xf32>
    %107 = arith.addf %105, %106 : vector<8x32xf32>
    %c0_41 = arith.constant 0 : index
    %c0_42 = arith.constant 0 : index
    %c0_43 = arith.constant 0 : index
    %108 = vector.load %arg10[%c0_41, %c0_42, %c0_43] : memref<2x32x128xf32, #tpu.memory_space<vmem>>, vector<1x32x128xf32>
    %109 = vector.shape_cast %108 : vector<1x32x128xf32> to vector<32x128xf32>
    %cst_44 = arith.constant dense<0.000000e+00> : vector<8x128xf32>
    %110 = tpu.matmul %107, %109, %cst_44 {dimension_numbers = #tpu.dot_dimension_numbers<[1], [0], [0], [1], [0, 0, 1, 1], [], []>} : vector<8x32xf32>, vector<32x128xf32>, vector<8x128xf32> -> vector<8x128xf32>
    %c0_45 = arith.constant 0 : index
    %c0_46 = arith.constant 0 : index
    %c0_47 = arith.constant 0 : index
    %111 = vector.load %arg11[%c0_45, %c0_46, %c0_47] : memref<2x1x128xf32, #tpu.memory_space<vmem>>, vector<1x1x128xf32>
    %112 = vector.shape_cast %111 : vector<1x1x128xf32> to vector<1x128xf32>
    %113 = vector.broadcast %112 : vector<1x128xf32> to vector<8x128xf32>
    %114 = arith.addf %110, %113 : vector<8x128xf32>
    %115 = arith.mulf %114, %114 : vector<8x128xf32>
    %116 = arith.mulf %114, %115 : vector<8x128xf32>
    %cst_48 = arith.constant 4.471500e-02 : f32
    %117 = vector.broadcast %cst_48 : f32 to vector<8x128xf32>
    %118 = arith.mulf %117, %116 : vector<8x128xf32>
    %119 = arith.addf %114, %118 : vector<8x128xf32>
    %cst_49 = arith.constant 0.797884583 : f32
    %120 = vector.broadcast %cst_49 : f32 to vector<8x128xf32>
    %121 = arith.mulf %120, %119 : vector<8x128xf32>
    %122 = math.tanh %121 : vector<8x128xf32>
    %cst_50 = arith.constant 1.000000e+00 : f32
    %123 = vector.broadcast %cst_50 : f32 to vector<8x128xf32>
    %124 = arith.addf %123, %122 : vector<8x128xf32>
    %cst_51 = arith.constant 5.000000e-01 : f32
    %125 = vector.broadcast %cst_51 : f32 to vector<8x128xf32>
    %126 = arith.mulf %125, %124 : vector<8x128xf32>
    %127 = arith.mulf %114, %126 : vector<8x128xf32>
    %c0_52 = arith.constant 0 : index
    %c0_53 = arith.constant 0 : index
    %c0_54 = arith.constant 0 : index
    %128 = vector.load %arg12[%c0_52, %c0_53, %c0_54] : memref<2x128x32xf32, #tpu.memory_space<vmem>>, vector<1x128x32xf32>
    %129 = vector.shape_cast %128 : vector<1x128x32xf32> to vector<128x32xf32>
    %cst_55 = arith.constant dense<0.000000e+00> : vector<8x32xf32>
    %130 = tpu.matmul %127, %129, %cst_55 {dimension_numbers = #tpu.dot_dimension_numbers<[1], [0], [0], [1], [0, 0, 1, 1], [], []>} : vector<8x128xf32>, vector<128x32xf32>, vector<8x32xf32> -> vector<8x32xf32>
    %131 = arith.addf %81, %130 : vector<8x32xf32>
    %c0_56 = arith.constant 0 : index
    %c0_57 = arith.constant 0 : index
    %c0_58 = arith.constant 0 : index
    %132 = vector.load %arg13[%c0_56, %c0_57, %c0_58] : memref<2x1x32xf32, #tpu.memory_space<vmem>>, vector<1x1x32xf32>
    %133 = vector.shape_cast %132 : vector<1x1x32xf32> to vector<1x32xf32>
    %134 = vector.broadcast %133 : vector<1x32xf32> to vector<8x32xf32>
    %135 = arith.addf %131, %134 : vector<8x32xf32>
    %c1 = arith.constant 1 : index
    %c0_59 = arith.constant 0 : index
    %c0_60 = arith.constant 0 : index
    %136 = vector.load %arg4[%c1, %c0_59, %c0_60] : memref<2x1x32xf32, #tpu.memory_space<vmem>>, vector<1x1x32xf32>
    %137 = vector.shape_cast %136 : vector<1x1x32xf32> to vector<1x32xf32>
    %c1_61 = arith.constant 1 : index
    %c0_62 = arith.constant 0 : index
    %c0_63 = arith.constant 0 : index
    %138 = vector.load %arg5[%c1_61, %c0_62, %c0_63] : memref<2x1x32xf32, #tpu.memory_space<vmem>>, vector<1x1x32xf32>
    %139 = vector.shape_cast %138 : vector<1x1x32xf32> to vector<1x32xf32>
    %cst_64 = arith.constant dense<0.000000e+00> : vector<8xf32>
    %140 = vector.multi_reduction <add>, %135, %cst_64 [1] : vector<8x32xf32> to vector<8xf32>
    %141 = vector.shape_cast %140 : vector<8xf32> to vector<8x1xf32>
    %cst_65 = arith.constant 3.200000e+01 : f32
    %142 = vector.broadcast %cst_65 : f32 to vector<8x1xf32>
    %143 = arith.divf %141, %142 : vector<8x1xf32>
    %144 = vector.broadcast %143 : vector<8x1xf32> to vector<8x32xf32>
    %145 = arith.subf %135, %144 : vector<8x32xf32>
    %146 = arith.mulf %145, %145 : vector<8x32xf32>
    %cst_66 = arith.constant dense<0.000000e+00> : vector<8xf32>
    %147 = vector.multi_reduction <add>, %146, %cst_66 [1] : vector<8x32xf32> to vector<8xf32>
    %148 = vector.shape_cast %147 : vector<8xf32> to vector<8x1xf32>
    %cst_67 = arith.constant 3.200000e+01 : f32
    %149 = vector.broadcast %cst_67 : f32 to vector<8x1xf32>
    %150 = arith.divf %148, %149 : vector<8x1xf32>
    %151 = vector.broadcast %143 : vector<8x1xf32> to vector<8x32xf32>
    %152 = arith.subf %135, %151 : vector<8x32xf32>
    %cst_68 = arith.constant 9.99999974E-6 : f32
    %153 = vector.broadcast %cst_68 : f32 to vector<8x1xf32>
    %154 = arith.addf %150, %153 : vector<8x1xf32>
    %155 = math.rsqrt %154 : vector<8x1xf32>
    %156 = vector.broadcast %155 : vector<8x1xf32> to vector<8x32xf32>
    %157 = arith.mulf %152, %156 : vector<8x32xf32>
    %158 = vector.broadcast %137 : vector<1x32xf32> to vector<8x32xf32>
    %159 = arith.mulf %157, %158 : vector<8x32xf32>
    %160 = vector.broadcast %139 : vector<1x32xf32> to vector<8x32xf32>
    %161 = arith.addf %159, %160 : vector<8x32xf32>
    %c1_69 = arith.constant 1 : index
    %c0_70 = arith.constant 0 : index
    %c0_71 = arith.constant 0 : index
    %162 = vector.load %arg6[%c1_69, %c0_70, %c0_71] : memref<2x32x768xf32, #tpu.memory_space<vmem>>, vector<1x32x768xf32>
    %163 = vector.shape_cast %162 : vector<1x32x768xf32> to vector<32x768xf32>
    %cst_72 = arith.constant dense<0.000000e+00> : vector<8x768xf32>
    %164 = tpu.matmul %161, %163, %cst_72 {dimension_numbers = #tpu.dot_dimension_numbers<[1], [0], [0], [1], [0, 0, 1, 1], [], []>} : vector<8x32xf32>, vector<32x768xf32>, vector<8x768xf32> -> vector<8x768xf32>
    %165 = vector.extract_strided_slice %164 {offsets = [0, 0], sizes = [8, 64], strides = [1, 1]} : vector<8x768xf32> to vector<8x64xf32>
    %166 = vector.extract_strided_slice %164 {offsets = [0, 64], sizes = [8, 64], strides = [1, 1]} : vector<8x768xf32> to vector<8x64xf32>
    %167 = vector.extract_strided_slice %164 {offsets = [0, 128], sizes = [8, 64], strides = [1, 1]} : vector<8x768xf32> to vector<8x64xf32>
    %168 = vector.extract_strided_slice %164 {offsets = [0, 192], sizes = [8, 64], strides = [1, 1]} : vector<8x768xf32> to vector<8x64xf32>
    %169 = vector.shape_cast %165 : vector<8x64xf32> to vector<1x8x64xf32>
    %170 = vector.shape_cast %166 : vector<8x64xf32> to vector<1x8x64xf32>
    %171 = vector.shape_cast %167 : vector<8x64xf32> to vector<1x8x64xf32>
    %172 = vector.shape_cast %168 : vector<8x64xf32> to vector<1x8x64xf32>
    %173 = tpu.concatenate %169, %170, %171, %172 in 0 : vector<1x8x64xf32>, vector<1x8x64xf32>, vector<1x8x64xf32>, vector<1x8x64xf32> -> vector<4x8x64xf32>
    %174 = vector.extract_strided_slice %164 {offsets = [0, 256], sizes = [8, 64], strides = [1, 1]} : vector<8x768xf32> to vector<8x64xf32>
    %175 = vector.extract_strided_slice %164 {offsets = [0, 320], sizes = [8, 64], strides = [1, 1]} : vector<8x768xf32> to vector<8x64xf32>
    %176 = vector.extract_strided_slice %164 {offsets = [0, 384], sizes = [8, 64], strides = [1, 1]} : vector<8x768xf32> to vector<8x64xf32>
    %177 = vector.extract_strided_slice %164 {offsets = [0, 448], sizes = [8, 64], strides = [1, 1]} : vector<8x768xf32> to vector<8x64xf32>
    %178 = vector.shape_cast %174 : vector<8x64xf32> to vector<1x8x64xf32>
    %179 = vector.shape_cast %175 : vector<8x64xf32> to vector<1x8x64xf32>
    %180 = vector.shape_cast %176 : vector<8x64xf32> to vector<1x8x64xf32>
    %181 = vector.shape_cast %177 : vector<8x64xf32> to vector<1x8x64xf32>
    %182 = tpu.concatenate %178, %179, %180, %181 in 0 : vector<1x8x64xf32>, vector<1x8x64xf32>, vector<1x8x64xf32>, vector<1x8x64xf32> -> vector<4x8x64xf32>
    %183 = vector.extract_strided_slice %164 {offsets = [0, 512], sizes = [8, 64], strides = [1, 1]} : vector<8x768xf32> to vector<8x64xf32>
    %184 = vector.extract_strided_slice %164 {offsets = [0, 576], sizes = [8, 64], strides = [1, 1]} : vector<8x768xf32> to vector<8x64xf32>
    %185 = vector.extract_strided_slice %164 {offsets = [0, 640], sizes = [8, 64], strides = [1, 1]} : vector<8x768xf32> to vector<8x64xf32>
    %186 = vector.extract_strided_slice %164 {offsets = [0, 704], sizes = [8, 64], strides = [1, 1]} : vector<8x768xf32> to vector<8x64xf32>
    %187 = vector.shape_cast %183 : vector<8x64xf32> to vector<1x8x64xf32>
    %188 = vector.shape_cast %184 : vector<8x64xf32> to vector<1x8x64xf32>
    %189 = vector.shape_cast %185 : vector<8x64xf32> to vector<1x8x64xf32>
    %190 = vector.shape_cast %186 : vector<8x64xf32> to vector<1x8x64xf32>
    %191 = tpu.concatenate %187, %188, %189, %190 in 0 : vector<1x8x64xf32>, vector<1x8x64xf32>, vector<1x8x64xf32>, vector<1x8x64xf32> -> vector<4x8x64xf32>
    %cst_73 = arith.constant dense<0.000000e+00> : vector<4x8x8xf32>
    %192 = tpu.matmul %173, %182, %cst_73 {dimension_numbers = #tpu.dot_dimension_numbers<[2], [2], [1], [1], [0, 0, 0, 1, 1, 1], [0], [0]>} : vector<4x8x64xf32>, vector<4x8x64xf32>, vector<4x8x8xf32> -> vector<4x8x8xf32>
    %cst_74 = arith.constant 1.250000e-01 : f32
    %193 = vector.broadcast %cst_74 : f32 to vector<4x8x8xf32>
    %194 = arith.mulf %192, %193 : vector<4x8x8xf32>
    %195 = vector.shape_cast %3 : vector<1x8xf32> to vector<1x1x8xf32>
    %196 = vector.broadcast %195 : vector<1x1x8xf32> to vector<4x8x8xf32>
    %197 = arith.addf %194, %196 : vector<4x8x8xf32>
    %cst_75 = arith.constant dense<0xFF800000> : vector<4x8xf32>
    %198 = vector.multi_reduction <maximumf>, %197, %cst_75 [2] : vector<4x8x8xf32> to vector<4x8xf32>
    %199 = vector.shape_cast %198 : vector<4x8xf32> to vector<4x8x1xf32>
    %200 = vector.broadcast %199 : vector<4x8x1xf32> to vector<4x8x8xf32>
    %201 = arith.subf %197, %200 : vector<4x8x8xf32>
    %202 = math.exp %201 : vector<4x8x8xf32>
    %cst_76 = arith.constant dense<0.000000e+00> : vector<4x8xf32>
    %203 = vector.multi_reduction <add>, %202, %cst_76 [2] : vector<4x8x8xf32> to vector<4x8xf32>
    %204 = vector.shape_cast %203 : vector<4x8xf32> to vector<4x8x1xf32>
    %205 = tpu.reciprocal %204 {approx = true} : vector<4x8x1xf32> -> vector<4x8x1xf32>
    %206 = vector.broadcast %205 : vector<4x8x1xf32> to vector<4x8x8xf32>
    %207 = arith.mulf %202, %206 : vector<4x8x8xf32>
    %cst_77 = arith.constant dense<0.000000e+00> : vector<4x8x64xf32>
    %208 = tpu.matmul %207, %191, %cst_77 {dimension_numbers = #tpu.dot_dimension_numbers<[2], [1], [1], [2], [0, 0, 0, 1, 1, 2], [0], [0]>} : vector<4x8x8xf32>, vector<4x8x64xf32>, vector<4x8x64xf32> -> vector<4x8x64xf32>
    %c1_78 = arith.constant 1 : index
    %c0_79 = arith.constant 0 : index
    %c0_80 = arith.constant 0 : index
    %c0_81 = arith.constant 0 : index
    %209 = vector.load %arg7[%c1_78, %c0_79, %c0_80, %c0_81] : memref<2x4x64x32xf32, #tpu.memory_space<vmem>>, vector<1x4x64x32xf32>
    %210 = vector.shape_cast %209 : vector<1x4x64x32xf32> to vector<4x64x32xf32>
    %cst_82 = arith.constant dense<0.000000e+00> : vector<4x8x32xf32>
    %211 = tpu.matmul %208, %210, %cst_82 {dimension_numbers = #tpu.dot_dimension_numbers<[2], [1], [1], [2], [0, 0, 0, 1, 1, 2], [0], [0]>} : vector<4x8x64xf32>, vector<4x64x32xf32>, vector<4x8x32xf32> -> vector<4x8x32xf32>
    %cst_83 = arith.constant dense<0.000000e+00> : vector<8x32xf32>
    %212 = vector.multi_reduction <add>, %211, %cst_83 [0] : vector<4x8x32xf32> to vector<8x32xf32>
    %213 = arith.addf %135, %212 : vector<8x32xf32>
    %c1_84 = arith.constant 1 : index
    %c0_85 = arith.constant 0 : index
    %c0_86 = arith.constant 0 : index
    %214 = vector.load %arg8[%c1_84, %c0_85, %c0_86] : memref<2x1x32xf32, #tpu.memory_space<vmem>>, vector<1x1x32xf32>
    %215 = vector.shape_cast %214 : vector<1x1x32xf32> to vector<1x32xf32>
    %c1_87 = arith.constant 1 : index
    %c0_88 = arith.constant 0 : index
    %c0_89 = arith.constant 0 : index
    %216 = vector.load %arg9[%c1_87, %c0_88, %c0_89] : memref<2x1x32xf32, #tpu.memory_space<vmem>>, vector<1x1x32xf32>
    %217 = vector.shape_cast %216 : vector<1x1x32xf32> to vector<1x32xf32>
    %cst_90 = arith.constant dense<0.000000e+00> : vector<8xf32>
    %218 = vector.multi_reduction <add>, %213, %cst_90 [1] : vector<8x32xf32> to vector<8xf32>
    %219 = vector.shape_cast %218 : vector<8xf32> to vector<8x1xf32>
    %cst_91 = arith.constant 3.200000e+01 : f32
    %220 = vector.broadcast %cst_91 : f32 to vector<8x1xf32>
    %221 = arith.divf %219, %220 : vector<8x1xf32>
    %222 = vector.broadcast %221 : vector<8x1xf32> to vector<8x32xf32>
    %223 = arith.subf %213, %222 : vector<8x32xf32>
    %224 = arith.mulf %223, %223 : vector<8x32xf32>
    %cst_92 = arith.constant dense<0.000000e+00> : vector<8xf32>
    %225 = vector.multi_reduction <add>, %224, %cst_92 [1] : vector<8x32xf32> to vector<8xf32>
    %226 = vector.shape_cast %225 : vector<8xf32> to vector<8x1xf32>
    %cst_93 = arith.constant 3.200000e+01 : f32
    %227 = vector.broadcast %cst_93 : f32 to vector<8x1xf32>
    %228 = arith.divf %226, %227 : vector<8x1xf32>
    %229 = vector.broadcast %221 : vector<8x1xf32> to vector<8x32xf32>
    %230 = arith.subf %213, %229 : vector<8x32xf32>
    %cst_94 = arith.constant 9.99999974E-6 : f32
    %231 = vector.broadcast %cst_94 : f32 to vector<8x1xf32>
    %232 = arith.addf %228, %231 : vector<8x1xf32>
    %233 = math.rsqrt %232 : vector<8x1xf32>
    %234 = vector.broadcast %233 : vector<8x1xf32> to vector<8x32xf32>
    %235 = arith.mulf %230, %234 : vector<8x32xf32>
    %236 = vector.broadcast %215 : vector<1x32xf32> to vector<8x32xf32>
    %237 = arith.mulf %235, %236 : vector<8x32xf32>
    %238 = vector.broadcast %217 : vector<1x32xf32> to vector<8x32xf32>
    %239 = arith.addf %237, %238 : vector<8x32xf32>
    %c1_95 = arith.constant 1 : index
    %c0_96 = arith.constant 0 : index
    %c0_97 = arith.constant 0 : index
    %240 = vector.load %arg10[%c1_95, %c0_96, %c0_97] : memref<2x32x128xf32, #tpu.memory_space<vmem>>, vector<1x32x128xf32>
    %241 = vector.shape_cast %240 : vector<1x32x128xf32> to vector<32x128xf32>
    %cst_98 = arith.constant dense<0.000000e+00> : vector<8x128xf32>
    %242 = tpu.matmul %239, %241, %cst_98 {dimension_numbers = #tpu.dot_dimension_numbers<[1], [0], [0], [1], [0, 0, 1, 1], [], []>} : vector<8x32xf32>, vector<32x128xf32>, vector<8x128xf32> -> vector<8x128xf32>
    %c1_99 = arith.constant 1 : index
    %c0_100 = arith.constant 0 : index
    %c0_101 = arith.constant 0 : index
    %243 = vector.load %arg11[%c1_99, %c0_100, %c0_101] : memref<2x1x128xf32, #tpu.memory_space<vmem>>, vector<1x1x128xf32>
    %244 = vector.shape_cast %243 : vector<1x1x128xf32> to vector<1x128xf32>
    %245 = vector.broadcast %244 : vector<1x128xf32> to vector<8x128xf32>
    %246 = arith.addf %242, %245 : vector<8x128xf32>
    %247 = arith.mulf %246, %246 : vector<8x128xf32>
    %248 = arith.mulf %246, %247 : vector<8x128xf32>
    %cst_102 = arith.constant 4.471500e-02 : f32
    %249 = vector.broadcast %cst_102 : f32 to vector<8x128xf32>
    %250 = arith.mulf %249, %248 : vector<8x128xf32>
    %251 = arith.addf %246, %250 : vector<8x128xf32>
    %cst_103 = arith.constant 0.797884583 : f32
    %252 = vector.broadcast %cst_103 : f32 to vector<8x128xf32>
    %253 = arith.mulf %252, %251 : vector<8x128xf32>
    %254 = math.tanh %253 : vector<8x128xf32>
    %cst_104 = arith.constant 1.000000e+00 : f32
    %255 = vector.broadcast %cst_104 : f32 to vector<8x128xf32>
    %256 = arith.addf %255, %254 : vector<8x128xf32>
    %cst_105 = arith.constant 5.000000e-01 : f32
    %257 = vector.broadcast %cst_105 : f32 to vector<8x128xf32>
    %258 = arith.mulf %257, %256 : vector<8x128xf32>
    %259 = arith.mulf %246, %258 : vector<8x128xf32>
    %c1_106 = arith.constant 1 : index
    %c0_107 = arith.constant 0 : index
    %c0_108 = arith.constant 0 : index
    %260 = vector.load %arg12[%c1_106, %c0_107, %c0_108] : memref<2x128x32xf32, #tpu.memory_space<vmem>>, vector<1x128x32xf32>
    %261 = vector.shape_cast %260 : vector<1x128x32xf32> to vector<128x32xf32>
    %cst_109 = arith.constant dense<0.000000e+00> : vector<8x32xf32>
    %262 = tpu.matmul %259, %261, %cst_109 {dimension_numbers = #tpu.dot_dimension_numbers<[1], [0], [0], [1], [0, 0, 1, 1], [], []>} : vector<8x128xf32>, vector<128x32xf32>, vector<8x32xf32> -> vector<8x32xf32>
    %263 = arith.addf %213, %262 : vector<8x32xf32>
    %c1_110 = arith.constant 1 : index
    %c0_111 = arith.constant 0 : index
    %c0_112 = arith.constant 0 : index
    %264 = vector.load %arg13[%c1_110, %c0_111, %c0_112] : memref<2x1x32xf32, #tpu.memory_space<vmem>>, vector<1x1x32xf32>
    %265 = vector.shape_cast %264 : vector<1x1x32xf32> to vector<1x32xf32>
    %266 = vector.broadcast %265 : vector<1x32xf32> to vector<8x32xf32>
    %267 = arith.addf %263, %266 : vector<8x32xf32>
    %c0_113 = arith.constant 0 : index
    %c0_114 = arith.constant 0 : index
    %268 = vector.load %arg14[%c0_113, %c0_114] : memref<1x32xf32, #tpu.memory_space<vmem>>, vector<1x32xf32>
    %c0_115 = arith.constant 0 : index
    %c0_116 = arith.constant 0 : index
    %269 = vector.load %arg15[%c0_115, %c0_116] : memref<1x32xf32, #tpu.memory_space<vmem>>, vector<1x32xf32>
    %cst_117 = arith.constant dense<0.000000e+00> : vector<8xf32>
    %270 = vector.multi_reduction <add>, %267, %cst_117 [1] : vector<8x32xf32> to vector<8xf32>
    %271 = vector.shape_cast %270 : vector<8xf32> to vector<8x1xf32>
    %cst_118 = arith.constant 3.200000e+01 : f32
    %272 = vector.broadcast %cst_118 : f32 to vector<8x1xf32>
    %273 = arith.divf %271, %272 : vector<8x1xf32>
    %274 = vector.broadcast %273 : vector<8x1xf32> to vector<8x32xf32>
    %275 = arith.subf %267, %274 : vector<8x32xf32>
    %276 = arith.mulf %275, %275 : vector<8x32xf32>
    %cst_119 = arith.constant dense<0.000000e+00> : vector<8xf32>
    %277 = vector.multi_reduction <add>, %276, %cst_119 [1] : vector<8x32xf32> to vector<8xf32>
    %278 = vector.shape_cast %277 : vector<8xf32> to vector<8x1xf32>
    %cst_120 = arith.constant 3.200000e+01 : f32
    %279 = vector.broadcast %cst_120 : f32 to vector<8x1xf32>
    %280 = arith.divf %278, %279 : vector<8x1xf32>
    %281 = vector.broadcast %273 : vector<8x1xf32> to vector<8x32xf32>
    %282 = arith.subf %267, %281 : vector<8x32xf32>
    %cst_121 = arith.constant 9.99999974E-6 : f32
    %283 = vector.broadcast %cst_121 : f32 to vector<8x1xf32>
    %284 = arith.addf %280, %283 : vector<8x1xf32>
    %285 = math.rsqrt %284 : vector<8x1xf32>
    %286 = vector.broadcast %285 : vector<8x1xf32> to vector<8x32xf32>
    %287 = arith.mulf %282, %286 : vector<8x32xf32>
    %288 = vector.broadcast %268 : vector<1x32xf32> to vector<8x32xf32>
    %289 = arith.mulf %287, %288 : vector<8x32xf32>
    %290 = vector.broadcast %269 : vector<1x32xf32> to vector<8x32xf32>
    %291 = arith.addf %289, %290 : vector<8x32xf32>
    %c0_122 = arith.constant 0 : index
    %c0_123 = arith.constant 0 : index
    %292 = vector.load %arg16[%c0_122, %c0_123] : memref<32x32xf32, #tpu.memory_space<vmem>>, vector<32x32xf32>
    %cst_124 = arith.constant dense<0.000000e+00> : vector<8x32xf32>
    %293 = tpu.matmul %291, %292, %cst_124 {dimension_numbers = #tpu.dot_dimension_numbers<[1], [0], [0], [1], [0, 0, 1, 1], [], []>} : vector<8x32xf32>, vector<32x32xf32>, vector<8x32xf32> -> vector<8x32xf32>
    %c0_125 = arith.constant 0 : index
    %c0_126 = arith.constant 0 : index
    %294 = vector.load %arg17[%c0_125, %c0_126] : memref<1x32xf32, #tpu.memory_space<vmem>>, vector<1x32xf32>
    %295 = vector.broadcast %294 : vector<1x32xf32> to vector<8x32xf32>
    %296 = arith.addf %293, %295 : vector<8x32xf32>
    %c0_127 = arith.constant 0 : index
    %c0_128 = arith.constant 0 : index
    %c0_129 = arith.constant 0 : index
    %297 = vector.load %arg20[%c0_127, %c0_128, %c0_129] : memref<1x8x32xf32, #tpu.memory_space<vmem>>, vector<1x8x32xf32>
    %298 = vector.shape_cast %297 : vector<1x8x32xf32> to vector<8x32xf32>
    %299 = vector.shape_cast %296 : vector<8x32xf32> to vector<1x8x32xf32>
    tpu.vector_store %arg20[%c0_127, %c0_128, %c0_129], %299 {strides = array<i32>} : memref<1x8x32xf32, #tpu.memory_space<vmem>>, vector<1x8x32xf32>,
    %c0_130 = arith.constant 0 : index
    %c0_131 = arith.constant 0 : index
    %300 = vector.load %arg18[%c0_130, %c0_131] : memref<1x32xf32, #tpu.memory_space<vmem>>, vector<1x32xf32>
    %cst_132 = arith.constant dense<0.000000e+00> : vector<1x8xf32>
    %301 = tpu.matmul %300, %296, %cst_132 {dimension_numbers = #tpu.dot_dimension_numbers<[1], [1], [0], [0], [0, 0, 1, 0], [], []>} : vector<1x32xf32>, vector<8x32xf32>, vector<1x8xf32> -> vector<1x8xf32>
    %c0_133 = arith.constant 0 : index
    %c0_134 = arith.constant 0 : index
    %302 = vector.load %arg19[%c0_133, %c0_134] : memref<1x1xf32, #tpu.memory_space<vmem>>, vector<1x1xf32>
    %303 = vector.broadcast %302 : vector<1x1xf32> to vector<1x8xf32>
    %304 = arith.addf %301, %303 : vector<1x8xf32>
    %305 = math.tanh %304 : vector<1x8xf32>
    %c0_135 = arith.constant 0 : index
    %c0_136 = arith.constant 0 : index
    %c0_137 = arith.constant 0 : index
    %306 = vector.load %arg3[%c0_135, %c0_136, %c0_137] : memref<1x1x8xf32, #tpu.memory_space<vmem>>, vector<1x1x8xf32>
    %307 = vector.shape_cast %306 : vector<1x1x8xf32> to vector<1x8xf32>
    %308 = arith.addf %305, %307 : vector<1x8xf32>
    %cst_138 = arith.constant dense<0xFF800000> : vector<1xf32>
    %309 = vector.multi_reduction <maximumf>, %308, %cst_138 [1] : vector<1x8xf32> to vector<1xf32>
    %310 = vector.shape_cast %309 : vector<1xf32> to vector<1x1xf32>
    %311 = vector.broadcast %310 : vector<1x1xf32> to vector<1x8xf32>
    %312 = arith.subf %308, %311 : vector<1x8xf32>
    %313 = math.exp %312 : vector<1x8xf32>
    %cst_139 = arith.constant dense<0.000000e+00> : vector<1xf32>
    %314 = vector.multi_reduction <add>, %313, %cst_139 [1] : vector<1x8xf32> to vector<1xf32>
    %315 = vector.shape_cast %314 : vector<1xf32> to vector<1x1xf32>
    %316 = tpu.reciprocal %315 {approx = true} : vector<1x1xf32> -> vector<1x1xf32>
    %317 = vector.broadcast %316 : vector<1x1xf32> to vector<1x8xf32>
    %318 = arith.mulf %313, %317 : vector<1x8xf32>
    %cst_140 = arith.constant dense<0.000000e+00> : vector<1x32xf32>
    %319 = tpu.matmul %318, %296, %cst_140 {dimension_numbers = #tpu.dot_dimension_numbers<[1], [0], [0], [1], [0, 0, 1, 1], [], []>} : vector<1x8xf32>, vector<8x32xf32>, vector<1x32xf32> -> vector<1x32xf32>
    %c0_141 = arith.constant 0 : index
    %c0_142 = arith.constant 0 : index
    %c0_143 = arith.constant 0 : index
    %320 = vector.load %arg21[%c0_141, %c0_142, %c0_143] : memref<1x1x32xf32, #tpu.memory_space<vmem>>, vector<1x1x32xf32>
    %321 = vector.shape_cast %320 : vector<1x1x32xf32> to vector<1x32xf32>
    %322 = vector.shape_cast %319 : vector<1x32xf32> to vector<1x1x32xf32>
    tpu.vector_store %arg21[%c0_141, %c0_142, %c0_143], %322 {strides = array<i32>} : memref<1x1x32xf32, #tpu.memory_space<vmem>>, vector<1x1x32xf32>,
    %c0_144 = arith.constant 0 : index
    %c0_145 = arith.constant 0 : index
    %c0_146 = arith.constant 0 : index
    %323 = vector.load %arg22[%c0_144, %c0_145, %c0_146] : memref<1x1x8xf32, #tpu.memory_space<vmem>>, vector<1x1x8xf32>
    %324 = vector.shape_cast %323 : vector<1x1x8xf32> to vector<1x8xf32>
    %325 = vector.shape_cast %318 : vector<1x8xf32> to vector<1x1x8xf32>
    tpu.vector_store %arg22[%c0_144, %c0_145, %c0_146], %325 {strides = array<i32>} : memref<1x1x8xf32, #tpu.memory_space<vmem>>, vector<1x1x8xf32>,
    return
  }
  func.func @transform_0(%arg0: i32) -> (i32, i32, i32) {
    %c0_i32 = arith.constant 0 : i32
    %c0_i32_0 = arith.constant 0 : i32
    %c0_i32_1 = arith.constant 0 : i32
    return %arg0, %c0_i32, %c0_i32_0 : i32, i32, i32
  }
  func.func @transform_1(%arg0: i32) -> (i32, i32, i32) {
    %c0_i32 = arith.constant 0 : i32
    %c0_i32_0 = arith.constant 0 : i32
    %c0_i32_1 = arith.constant 0 : i32
    return %arg0, %c0_i32, %c0_i32_0 : i32, i32, i32
  }
  func.func @transform_2(%arg0: i32) -> (i32, i32, i32) {
    %c0_i32 = arith.constant 0 : i32
    %c0_i32_0 = arith.constant 0 : i32
    %c0_i32_1 = arith.constant 0 : i32
    return %arg0, %c0_i32, %c0_i32_0 : i32, i32, i32
  }
  func.func @transform_3(%arg0: i32) -> (i32, i32, i32) {
    %c0_i32 = arith.constant 0 : i32
    %c0_i32_0 = arith.constant 0 : i32
    %c0_i32_1 = arith.constant 0 : i32
    %c0_i32_2 = arith.constant 0 : i32
    return %c0_i32, %c0_i32_0, %c0_i32_1 : i32, i32, i32
  }
  func.func @transform_4(%arg0: i32) -> (i32, i32, i32) {
    %c0_i32 = arith.constant 0 : i32
    %c0_i32_0 = arith.constant 0 : i32
    %c0_i32_1 = arith.constant 0 : i32
    %c0_i32_2 = arith.constant 0 : i32
    return %c0_i32, %c0_i32_0, %c0_i32_1 : i32, i32, i32
  }
  func.func @transform_5(%arg0: i32) -> (i32, i32, i32) {
    %c0_i32 = arith.constant 0 : i32
    %c0_i32_0 = arith.constant 0 : i32
    %c0_i32_1 = arith.constant 0 : i32
    %c0_i32_2 = arith.constant 0 : i32
    return %c0_i32, %c0_i32_0, %c0_i32_1 : i32, i32, i32
  }
  func.func @transform_6(%arg0: i32) -> (i32, i32, i32, i32) {
    %c0_i32 = arith.constant 0 : i32
    %c0_i32_0 = arith.constant 0 : i32
    %c0_i32_1 = arith.constant 0 : i32
    %c0_i32_2 = arith.constant 0 : i32
    %c0_i32_3 = arith.constant 0 : i32
    return %c0_i32, %c0_i32_0, %c0_i32_1, %c0_i32_2 : i32, i32, i32, i32
  }
  func.func @transform_7(%arg0: i32) -> (i32, i32, i32) {
    %c0_i32 = arith.constant 0 : i32
    %c0_i32_0 = arith.constant 0 : i32
    %c0_i32_1 = arith.constant 0 : i32
    %c0_i32_2 = arith.constant 0 : i32
    return %c0_i32, %c0_i32_0, %c0_i32_1 : i32, i32, i32
  }
  func.func @transform_8(%arg0: i32) -> (i32, i32, i32) {
    %c0_i32 = arith.constant 0 : i32
    %c0_i32_0 = arith.constant 0 : i32
    %c0_i32_1 = arith.constant 0 : i32
    %c0_i32_2 = arith.constant 0 : i32
    return %c0_i32, %c0_i32_0, %c0_i32_1 : i32, i32, i32
  }
  func.func @transform_9(%arg0: i32) -> (i32, i32, i32) {
    %c0_i32 = arith.constant 0 : i32
    %c0_i32_0 = arith.constant 0 : i32
    %c0_i32_1 = arith.constant 0 : i32
    %c0_i32_2 = arith.constant 0 : i32
    return %c0_i32, %c0_i32_0, %c0_i32_1 : i32, i32, i32
  }
  func.func @transform_10(%arg0: i32) -> (i32, i32, i32) {
    %c0_i32 = arith.constant 0 : i32
    %c0_i32_0 = arith.constant 0 : i32
    %c0_i32_1 = arith.constant 0 : i32
    %c0_i32_2 = arith.constant 0 : i32
    return %c0_i32, %c0_i32_0, %c0_i32_1 : i32, i32, i32
  }
  func.func @transform_11(%arg0: i32) -> (i32, i32, i32) {
    %c0_i32 = arith.constant 0 : i32
    %c0_i32_0 = arith.constant 0 : i32
    %c0_i32_1 = arith.constant 0 : i32
    %c0_i32_2 = arith.constant 0 : i32
    return %c0_i32, %c0_i32_0, %c0_i32_1 : i32, i32, i32
  }
  func.func @transform_12(%arg0: i32) -> (i32, i32, i32) {
    %c0_i32 = arith.constant 0 : i32
    %c0_i32_0 = arith.constant 0 : i32
    %c0_i32_1 = arith.constant 0 : i32
    %c0_i32_2 = arith.constant 0 : i32
    return %c0_i32, %c0_i32_0, %c0_i32_1 : i32, i32, i32
  }
  func.func @transform_13(%arg0: i32) -> (i32, i32) {
    %c0_i32 = arith.constant 0 : i32
    %c0_i32_0 = arith.constant 0 : i32
    %c0_i32_1 = arith.constant 0 : i32
    return %c0_i32, %c0_i32_0 : i32, i32
  }
  func.func @transform_14(%arg0: i32) -> (i32, i32) {
    %c0_i32 = arith.constant 0 : i32
    %c0_i32_0 = arith.constant 0 : i32
    %c0_i32_1 = arith.constant 0 : i32
    return %c0_i32, %c0_i32_0 : i32, i32
  }
  func.func @transform_15(%arg0: i32) -> (i32, i32) {
    %c0_i32 = arith.constant 0 : i32
    %c0_i32_0 = arith.constant 0 : i32
    %c0_i32_1 = arith.constant 0 : i32
    return %c0_i32, %c0_i32_0 : i32, i32
  }
  func.func @transform_16(%arg0: i32) -> (i32, i32) {
    %c0_i32 = arith.constant 0 : i32
    %c0_i32_0 = arith.constant 0 : i32
    %c0_i32_1 = arith.constant 0 : i32
    return %c0_i32, %c0_i32_0 : i32, i32
  }
  func.func @transform_17(%arg0: i32) -> (i32, i32) {
    %c0_i32 = arith.constant 0 : i32
    %c0_i32_0 = arith.constant 0 : i32
    %c0_i32_1 = arith.constant 0 : i32
    return %c0_i32, %c0_i32_0 : i32, i32
  }
  func.func @transform_18(%arg0: i32) -> (i32, i32) {
    %c0_i32 = arith.constant 0 : i32
    %c0_i32_0 = arith.constant 0 : i32
    %c0_i32_1 = arith.constant 0 : i32
    return %c0_i32, %c0_i32_0 : i32, i32
  }
  func.func @transform_19(%arg0: i32) -> (i32, i32, i32) {
    %c0_i32 = arith.constant 0 : i32
    %c0_i32_0 = arith.constant 0 : i32
    %c0_i32_1 = arith.constant 0 : i32
    return %arg0, %c0_i32, %c0_i32_0 : i32, i32, i32
  }
  func.func @transform_20(%arg0: i32) -> (i32, i32, i32) {
    %c0_i32 = arith.constant 0 : i32
    %c0_i32_0 = arith.constant 0 : i32
    %c0_i32_1 = arith.constant 0 : i32
    return %arg0, %c0_i32, %c0_i32_0 : i32, i32, i32
  }
  func.func @transform_21(%arg0: i32) -> (i32, i32, i32) {
    %c0_i32 = arith.constant 0 : i32
    %c0_i32_0 = arith.constant 0 : i32
    %c0_i32_1 = arith.constant 0 : i32
    return %arg0, %c0_i32, %c0_i32_0 : i32, i32, i32
  }
}

</mosaic_0001>

<bundles_post_ra>
// kernel: model_forward.1
= control target key start
LH: loop header
LB: loop body
LE: loop exit
PB: predicated region body
PF: predicated region fallthrough
CT: control target
= control target key end

     0   :  { %s6341_s0 = inlined_call_operand.vmem [shape: f32[2,8,32], index: 0, kind: input, shape index: {}]   ;;  %s6342_s1 = inlined_call_operand.vmem [shape: f32[2,1,8], index: 1, kind: input, shape index: {}]   ;;  %s6343_s2 = inlined_call_operand.vmem [shape: f32[2,1,8], index: 2, kind: input, shape index: {}]   ;;  %s6344_s3 = inlined_call_operand.vmem [shape: f32[2,1,32], index: 3, kind: input, shape index: {}]   ;;  %s6345_s4 = inlined_call_operand.vmem [shape: f32[2,1,32], index: 4, kind: input, shape index: {}]   ;;  %s6346_s5 = inlined_call_operand.vmem [shape: f32[2,32,768], index: 5, kind: input, shape index: {}]   ;;  %s6347_s6 = inlined_call_operand.vmem [shape: f32[2,4,64,32], index: 6, kind: input, shape index: {}]   ;;  %s6348_s7 = inlined_call_operand.vmem [shape: f32[2,1,32], index: 7, kind: input, shape index: {}]   ;;  %s6349_s8 = inlined_call_operand.vmem [shape: f32[2,1,32], index: 8, kind: input, shape index: {}]   ;;  %s6350_s9 = inlined_call_operand.vmem [shape: f32[2,32,128], index: 9, kind: input, shape index: {}]   ;;  %s6351_s10 = inlined_call_operand.vmem [shape: f32[2,1,128], index: 10, kind: input, shape index: {}]   ;;  %s6352_s11 = inlined_call_operand.vmem [shape: f32[2,128,32], index: 11, kind: input, shape index: {}]   ;;  %s6353_s12 = inlined_call_operand.vmem [shape: f32[2,1,32], index: 12, kind: input, shape index: {}]   ;;  %s6354_s13 = inlined_call_operand.vmem [shape: f32[1,32], index: 13, kind: input, shape index: {}]   ;;  %s6355_s14 = inlined_call_operand.vmem [shape: f32[1,32], index: 14, kind: input, shape index: {}]   ;;  %s6356_s15 = inlined_call_operand.vmem [shape: f32[32,32], index: 15, kind: input, shape index: {}]   ;;  %s6357_s16 = inlined_call_operand.vmem [shape: f32[1,32], index: 16, kind: input, shape index: {}]   ;;  %s6358_s17 = inlined_call_operand.vmem [shape: f32[1,32], index: 17, kind: input, shape index: {}]   ;;  %s6359_s18 = inlined_call_operand.<no memory space> [shape: f32[1,1], index: 18, kind: input, shape index: {}]   ;;  %s6360_s19 = inlined_call_operand.hbm [shape: f32[2,8,32], index: 19, kind: output, shape index: {0}]   ;;  %s6361_s20 = inlined_call_operand.hbm [shape: f32[2,1,32], index: 20, kind: output, shape index: {1}]   ;;  %s6362_s21 = inlined_call_operand.hbm [shape: f32[2,1,8], index: 21, kind: output, shape index: {2}]  }
   0x1   :  { %6380 = sst [smem:[#allocation16_spill]] %s6341_s0  ;;  %v27_v0 = vstv %s6359_s18 }
   0x2   :  { %6381 = sst [smem:[#allocation17_spill]] %s6342_s1  ;;  %28 = vst [vmem:[#allocation2] sm:$0x1] %v27_v0 }
   0x3   :  { %6382 = sst [smem:[#allocation18_spill]] %s6343_s2 }
   0x4   :  { %6383 = sst [smem:[#allocation19_spill]] %s6344_s3 }
   0x5   :  { %6384 = sst [smem:[#allocation20_spill]] %s6345_s4 }
   0x6   :  { %6385 = sst [smem:[#allocation21_spill]] %s6346_s5 }
   0x7   :  { %6386 = sst [smem:[#allocation22_spill]] %s6347_s6 }
   0x8   :  { %6387 = sst [smem:[#allocation23_spill]] %s6348_s7 }
   0x9   :  { %6388 = sst [smem:[#allocation24_spill]] %s6361_s20 }
   0xa   :  { %6389 = sst [smem:[#allocation25_spill]] %s6362_s21 }
   0xb   :  { %29 = vsyncpa [#allocation4], 0 }
   0xc   :  { %31 = vsyncpa [#allocation4 + $0x1], 0 }
   0xd   :  { %32 = vsyncpa [#allocation6], 0 }
   0xe   :  { %34 = vsyncpa [#allocation6 + $0x1], 0  ;;  %s5364_s26 = smov 0   ;;  %s5366_s27 = smov 0  }
   0xf   :  { %s5368_s3 = smov 0   ;;  %s5370_s28 = smov 0  }
  0x10 LB: > { %6390 = sst [smem:[#allocation10_spill]] %s5229_s26  ;;  %s5385_s18 = sadd.s32 4294967295, %s5241_s28   ;;  %s5241_s28 = sphi %s5370_s28, %s6416_s28   ;;  %s5237_s3 = sphi %s5368_s3, %s6418_s3   ;;  %s5233_s27 = sphi %s5366_s27, %s6420_s27   ;;  %s5229_s26 = sphi %s5364_s26, %s6419_s26  }
  0x11   : > { %6391 = sst [smem:[#allocation11_spill]] %s5237_s3  ;;  %s6366_s29 = sadd.s32 4294967294, %s5241_s28  }
  0x12   : > { %6392 = sst [smem:[#allocation12_spill]] %s5241_s28  ;;  %s5389_s0 = sadd.s32 1, %s5241_s28  }
  0x13   : > { %6393 = sst [smem:[#allocation13_spill]] %s5389_s0  ;;  %s461_s4 = sadd.s32 1, %s5237_s3 }
  0x14   : > { %s458_s30 = ssub.s32 %s5241_s28, %s5389_s0  ;;  %p471_p0 = scmp.ne.s32.totalorder %s5237_s3, %s5233_s27 }
  0x15   : > { %p459_p1 = scmp.eq.s32.totalorder %s458_s30, 0  ;;  %p472_p2 = scmp.eq.s32.totalorder %s5385_s18, 1 }
  0x16   : > { %p477_p3 = scmp.ne.s32.totalorder %s5233_s27, %s5229_s26  ;;  %p478_p4 = scmp.eq.s32.totalorder %s6366_s29, 1 }
  0x17   : > { %s5402_s5 = scalar_select %p459_p1, %s5237_s3, %s461_s4  }
  0x18   : > { %p5404_p5 = por %p472_p2, %p471_p0  ;;  %p5408_p6 = por %p478_p4, %p477_p3 }
  0x19   : > { %6394 = sst [smem:[#allocation14_spill]] %s5402_s5  ;;  %p4149_p7 = scmp.ge.s32.totalorder %s5241_s28, 1 }
  0x1a   : > { %s6396_s23 = scalar_select %p5408_p6, 1, 0 }
  0x1b   : > { %p615_p8 = scmp.lt.s32.totalorder %s5241_s28, 3 }
  0x1c   : > { %6397 = sst [smem:[#allocation15_spill]] %s6396_s23 }
  0x1d   : > { %p616_p9 = pnand %p4149_p7, %p615_p8 }
  0x1e   : > { %p688_p10 = scmp.lt.s32.totalorder (!%p616_p9), %s5385_s18, 1  ;;  %vm702_vm0 = vcmask (!%p616_p9), 261120   ;;  %s6398_s4 = sld [smem:[#allocation16_spill]] (!%p616_p9)  ;;  %v5243_v15 = vmov (!%p616_p9), 0.0   ;;  %vm5244_vm1 = vmmov (!%p616_p9), 0   ;;  %vm991_vm2 = vcmask (!%p616_p9), 523264  }
  0x1f   : > { %619 = sbr.rel (%p616_p9) target bundleno = 6147 (0x1803), region = 96  ;;  %s6399_s3 = sld [smem:[#allocation21_spill]] (!%p616_p9)  ;;  %822 = vmatprep.mubr.f32.mxu0 (!%p616_p9), %v5243_v15  ;;  %893 = vmatprep.mubr.f32.mxu1 (!%p616_p9), %v5243_v15  ;;  %vm1302_vm3 = vcmask (!%p616_p9), 64512   ;;  %vm3880_vm4 = vcmask (!%p616_p9), 57344  }
  0x20   : > { %s6401_s23 = sld [smem:[#allocation19_spill]] (!%p616_p9)  ;;  %s6376_s20 = smov (!%p616_p9), 64  }
  0x21   : > { %s6403_s25 = sld [smem:[#allocation17_spill]] (!%p616_p9)  ;;  %s6404_s6 = sld [smem:[#allocation22_spill]] (!%p616_p9) }
  0x22   : > { %s6405_s7 = sld [smem:[#allocation23_spill]] (!%p616_p9)  ;;  %s6203_s28 = sand.u32 (!%p616_p9), 1, %s5233_s27  }
  0x23   : > { %s4150_s21 = sshll.u32 (!%p616_p9), %s6203_s28, 3  ;;  %s6407_s2 = sld [smem:[#allocation18_spill]] (!%p616_p9) }
  0x25   : > { %s6400_s0 = smov (!%p616_p9), %s6399_s3  ;;  %v732_v8 = vld [vmem:[%s6399_s3 + $0x8] sm:$0xff] (!%p616_p9)  ;;  %s6406_s3 = smov (!%p616_p9), 64  }
  0x26   : > { %s5416_s1 = scalar_select %p688_p10, %s5385_s18, 1  ;;  %v738_v9 = vld [vmem:[%s6400_s0 + $0x38] sm:$0xff]  ;;  %v731_v10 = vld [vmem:[%s6400_s0] sm:$0xff]  ;;  %v737_v12 = vld [vmem:[%s6400_s0 + $0x30] sm:$0xff] }
  0x27   : > { %v4802_v11 = vpack.c.bf16 %v738_v9, %v732_v8  ;;  %v734_v13 = vld [vmem:[%s6400_s0 + $0x18] sm:$0xff]  ;;  %v740_v14 = vld [vmem:[%s6400_s0 + $0x48] sm:$0xff]  ;;  %v4804_v16 = vpack.c.bf16 %v737_v12, %v731_v10  ;;  %v733_v18 = vld [vmem:[%s6400_s0 + $0x10] sm:$0xff] }
  0x28   : > { %s4151_s24 = sshll.u32 %s5416_s1, 3  ;;  %v4810_v17 = vpack.c.bf16 %v740_v14, %v734_v13  ;;  %v739_v19 = vld [vmem:[%s6400_s0 + $0x40] sm:$0xff]  ;;  %v744_v20 = vld [vmem:[%s6400_s0 + $0x68] sm:$0xff]  ;;  %v750_v22 = vld [vmem:[%s6400_s0 + $0x98] sm:$0xff] }
  0x29   : > { %s691_s30 = scalar_lea.vmem %s6398_s4, %s4151_s24  ;;  %4803 = vmatprep.subr.bf16.mxu0 %v4802_v11  ;;  %v4812_v21 = vpack.c.bf16 %v739_v19, %v733_v18  ;;  %v743_v23 = vld [vmem:[%s6400_s0 + $0x60] sm:$0xff]  ;;  %v749_v24 = vld [vmem:[%s6400_s0 + $0x90] sm:$0xff]  ;;  %v4806_v25 = vpack.c.bf16 %v750_v22, %v744_v20  ;;  %v746_v27 = vld [vmem:[%s6400_s0 + $0x78] sm:$0xff]  ;;  %s6402_s4 = sld [smem:[#allocation20_spill]] }
  0x2a   : > { %v5422_v1 = vld [vmem:[%s691_s30] sm:$0xff]  ;;  %4805 = vmatpush1.bf16.msra.mxu0 %v4804_v16  ;;  %4811 = vmatprep.subr.bf16.mxu1 %v4810_v17  ;;  %v4808_v26 = vpack.c.bf16 %v749_v24, %v743_v23  ;;  %v752_v28 = vld [vmem:[%s6400_s0 + $0xa8] sm:$0xff]  ;;  %v745_v29 = vld [vmem:[%s6400_s0 + $0x70] sm:$0xff]  ;;  %s694_s30 = scalar_lea.vmem %s6403_s25, %s5416_s1  ;;  %s697_s26 = scalar_lea.vmem %s6407_s2, %s5416_s1 }
  0x2b   : > { %v703_v2 = vsel %vm702_vm0, %v5422_v1, 0.0  ;;  %4813 = vmatpush1.bf16.msra.mxu1 %v4812_v21  ;;  %v4814_v30 = vpack.c.bf16 %v752_v28, %v746_v27  ;;  %v751_v31 = vld [vmem:[%s6400_s0 + $0xa0] sm:$0xff]  ;;  %v736_v32 = vld [vmem:[%s6400_s0 + $0x28] sm:$0xff]  ;;  %v742_v33 = vld [vmem:[%s6400_s0 + $0x58] sm:$0xff]  ;;  %4807 = vmatprep.subr.bf16.mxu0 %v4806_v25  ;;  %s687_s1 = scalar_lea.vmem [#allocation7], %s6203_s28  ;;  %s5248_s2 = smov [#allocation3]  }
  0x2c   : > { %704 = vadd.xlane.f32.xlu0 %v703_v2  ;;  %v4816_v34 = vpack.c.bf16 %v751_v31, %v745_v29  ;;  %v4818_v35 = vpack.c.bf16 %v742_v33, %v736_v32  ;;  %v4152_v40 = vld [vmem:[%s6401_s23] ss:$0 sm:$0xff]  ;;  %v741_v43 = vld [vmem:[%s6400_s0 + $0x50] sm:$0xff]  ;;  %v748_v45 = vld [vmem:[%s6400_s0 + $0x88] sm:$0xff] }
  0x2d   : > { %4815 = vmatprep.subr.bf16.mxu1 %v4814_v30  ;;  %v735_v42 = vld [vmem:[%s6400_s0 + $0x20] sm:$0xff]  ;;  %v754_v46 = vld [vmem:[%s6400_s0 + $0xb8] sm:$0xff]  ;;  %v753_v52 = vld [vmem:[%s6400_s0 + $0xb0] sm:$0xff] }
  0x2e   : > { %4809 = vmatpush1.bf16.msra.mxu0 %v4808_v26  ;;  %v4820_v48 = vpack.c.bf16 %v741_v43, %v735_v42  ;;  %v4822_v50 = vpack.c.bf16 %v754_v46, %v748_v45  ;;  %v747_v51 = vld [vmem:[%s6400_s0 + $0x80] sm:$0xff] }
  0x2f   : > { %4817 = vmatpush1.bf16.msra.mxu1 %v4816_v34  ;;  %4819 = vmatprep.subr.bf16.mxu0 %v4818_v35  ;;  %v4153_v44 = vld [vmem:[%s6402_s4] ss:$0 sm:$0xff]  ;;  %v4824_v53 = vpack.c.bf16 %v753_v52, %v747_v51 }
  0x30   : > { %4462 = vmatprep.subr.mxu1 %v5243_v15  ;;  %v5549_v0 = vld [vmem:[%s694_s30] ss:$0 sm:$0xff] }
  0xb9   : > { %v705_v3 = vpop.xlane.xlu0 %704 }
  0xba   : > { %v707_v4 = vmul.f32 0.03125, %v705_v3 }
  0xbc   : > { %v708_v5 = vsub.f32 %v5422_v1, %v707_v4 }
  0xbe   : > { %v709_v6 = vmul.f32 %v708_v5, %v708_v5 }
  0xc0   : > { %v710_v7 = vsel %vm702_vm0, %v709_v6, 0.0 }
  0xc1   : > { %711 = vadd.xlane.f32.xlu0 %v710_v7 }
 0x14e   : > { %v712_v36 = vpop.xlane.xlu0 %711 }
 0x14f   : > { %v713_v37 = vmul.f32 0.03125, %v712_v36 }
 0x151   : > { %v714_v38 = vadd.f32 1e-05, %v713_v37 }
 0x153   : > { %5067 = vrsqrt.f32 %v714_v38 }
 0x15d   : > { %v5068_v39 = vpop.eup %5067 }
 0x15e   : > { %v716_v41 = vmul.f32 %v5068_v39, %v708_v5 }
 0x160   : > { %v723_v47 = vmul.f32 %v4152_v40, %v716_v41 }
 0x162   : > { %v730_v49 = vadd.f32 %v4153_v44, %v723_v47 }
 0x164   : > { %4154 = vmatmul.mubr.msk.f32.vlgmr.msra.gmra.mrb[0].mxu0 %vm702_vm0, %v730_v49  ;;  %4155 = vmatmul.mubr.msk.f32.vlgmr.msra.gmra.mrb[0].mxu1 %vm702_vm0, %v730_v49 }
 0x165   : > { %4821 = vmatpush1.bf16.msra.mxu0 %v4820_v48  ;;  %964 = vmatprep.mubr.f32.mxu0 %v5243_v15  ;;  %v1639_v48 = vld [vmem:[%s6404_s6] sm:$0xff] }
 0x166   : > { %4823 = vmatprep.subr.bf16.mxu0 %v4822_v50  ;;  %4464 = vmatprep.mubr.msk.f32.mxu1 %vm5244_vm1, %v5243_v15 }
 0x169   : > { %4825 = vmatpush1.bf16.msra.mxu0 %v4824_v53  ;;  %v5246_v53 = vmov 0.0|0.0  }
 0x16a   : > { %4457 = vmatprep.subr.mxu0 %v5243_v15 }
 0x16c   : > { %4156 = vmatmul.mubr.msk.f32.vlgmr.msra.gmra.mrb[2].mxu0 %vm702_vm0, %v730_v49  ;;  %v1640_v49 = vld [vmem:[%s6404_s6 + $0x8] sm:$0xff] }
 0x16d   : > { %4459 = vmatprep.mubr.msk.f32.mxu0 %vm5244_vm1, %v5243_v15  ;;  %v4827_v51 = vpack.c.bf16 %v1640_v49, %v1639_v48 }
 0x237   : > { %v824_v54 = vpop.f32.mrb[0].mxu0  ;;  %v895_v55 = vpop.f32.mrb[0].mxu1 }
 0x238   : > { %978 = vrot.lane.b32.xlu1 %v895_v55, %s6376_s20  ;;  %v826_v56 = vpop.f32.mrb[1].mxu0  ;;  %v897_v57 = vpop.f32.mrb[1].mxu1  ;;  %4458 = vmatpush3.xpose.msk.msra.mxu0 %vm991_vm2, %v895_v55  ;;  %v1642_v55 = vld [vmem:[%s6404_s6 + $0x18] sm:$0xff] }
 0x239   : > { %981 = vrot.lane.b32.xlu0 %v897_v57, %s6376_s20  ;;  %4467 = vmatprep.subr.mxu0 %v5243_v15 }
 0x23b   : > { %4460 = vmatmul.mubr.msk.f32.vlgmr.msra.gmra.mrb[4].mxu0 %vm991_vm2, %v824_v54 }
 0x23c   : > { %972 = vrot.lane.b32.xlu1 %v824_v54, %s6376_s20  ;;  %4468 = vmatpush3.xpose.msk.msra.mxu0 %vm991_vm2, %v897_v57  ;;  %v1641_v54 = vld [vmem:[%s6404_s6 + $0x10] sm:$0xff]  ;;  %v1643_v57 = vld [vmem:[%s6404_s6 + $0x20] sm:$0xff] }
 0x23d   : > { %4469 = vmatprep.mubr.msk.f32.mxu0 %vm5244_vm1, %v5243_v15  ;;  %4477 = vmatprep.subr.mxu0 %v5243_v15 }
 0x23f   : > { %v966_v58 = vpop.f32.mrb[2].mxu0  ;;  %4470 = vmatmul.mubr.msk.f32.vlgmr.msra.gmra.mrb[6].mxu0 %vm991_vm2, %v826_v56 }
 0x240   : > { %v5529_v59 = vpop.f32.mrb[3].mxu0  ;;  %975 = vrot.lane.b32.xlu1 %v826_v56, %s6376_s20  ;;  %4478 = vmatpush3.msra.mxu0 %v966_v58  ;;  %v4830_v56 = vpack.c.bf16 %v1642_v55, %v1641_v54 }
 0x241   : > { %4479 = vmatprep.mubr.msk.f32.mxu0 %vm5244_vm1, %v5243_v15  ;;  %4487 = vmatprep.subr.mxu0 %v5243_v15 }
 0x2aa   : > { %v979_v60 = vpop.permute.xlu1 %978 }
 0x2ab   : > { %4463 = vmatpush3.xpose.msk.msra.mxu1 %vm991_vm2, %v979_v60  ;;  %v982_v62 = vpop.permute.xlu0 %981  ;;  %v1645_v60 = vld [vmem:[%s6404_s6 + $0x30] sm:$0xff] }
 0x2ac   : > { %4472 = vmatprep.subr.mxu1 %v5243_v15 }
 0x2ae   : > { %v973_v61 = vpop.permute.xlu1 %972 }
 0x2af   : > { %4465 = vmatmul.mubr.msk.f32.vlgmr.msra.gmra.mrb[2].mxu1 %vm991_vm2, %v973_v61  ;;  %v1646_v61 = vld [vmem:[%s6404_s6 + $0x38] sm:$0xff] }
 0x2b0   : > { %4473 = vmatpush3.xpose.msk.msra.mxu1 %vm991_vm2, %v982_v62  ;;  %4474 = vmatprep.mubr.msk.f32.mxu1 %vm5244_vm1, %v5243_v15  ;;  %v4836_v62 = vpack.c.bf16 %v1646_v61, %v1645_v60 }
 0x2b1   : > { %4482 = vmatprep.subr.mxu1 %v5243_v15 }
 0x2b2   : > { %v976_v63 = vpop.permute.xlu1 %975 }
 0x2b3   : > { %4475 = vmatmul.mubr.msk.f32.vlgmr.msra.gmra.mrb[4].mxu1 %vm991_vm2, %v976_v63 }
 0x2b4   : > { %4484 = vmatprep.mubr.msk.f32.mxu1 %vm5244_vm1, %v5243_v15 }
 0x30e   : > { %v1062_v2 = vpop.f32.mrb[4].mxu0 }
 0x30f   : > { %v1288_v3 = vmul.f32 0.125, %v1062_v2  ;;  %v4461_v4 = vpop.f32.mrb[5].mxu0 }
 0x311   : > { %v1298_v5 = vadd.f32 %v5549_v0, %v1288_v3 }
 0x312   : > { %v1210_v6 = vpop.f32.mrb[6].mxu0 }
 0x313   : > { %v1290_v7 = vmul.f32 0.125, %v1210_v6  ;;  %v4471_v8 = vpop.f32.mrb[7].mxu0  ;;  %v1303_v9 = vsel %vm1302_vm3, %v1298_v5, -inf  ;;  %v1648_v6 = vld [vmem:[%s6404_s6 + $0x48] sm:$0xff] }
 0x314   : > { %1304 = vmax.xlane.f32.xlu1 %v1303_v9 }
 0x315   : > { %v1300_v10 = vadd.f32 %v5549_v0, %v1290_v7 }
 0x317   : > { %v1309_v11 = vsel %vm1302_vm3, %v1300_v10, -inf }
 0x318   : > { %1310 = vmax.xlane.f32.xlu1 %v1309_v11  ;;  %v1649_v11 = vld [vmem:[%s6404_s6 + $0x50] sm:$0xff] }
 0x382   : > { %v1136_v12 = vpop.f32.mrb[2].mxu1 }
 0x383   : > { %v1289_v13 = vmul.f32 0.125, %v1136_v12  ;;  %v4466_v14 = vpop.f32.mrb[3].mxu1  ;;  %v1650_v12 = vld [vmem:[%s6404_s6 + $0x58] sm:$0xff] }
 0x384   : > { %v1651_v14 = vld [vmem:[%s6404_s6 + $0x60] sm:$0xff] }
 0x385   : > { %v1299_v16 = vadd.f32 %v5549_v0, %v1289_v13  ;;  %v4842_v13 = vpack.c.bf16 %v1650_v12, %v1649_v11 }
 0x386   : > { %v1284_v17 = vpop.f32.mrb[4].mxu1 }
 0x387   : > { %v1291_v18 = vmul.f32 0.125, %v1284_v17  ;;  %v4476_v19 = vpop.f32.mrb[5].mxu1  ;;  %v1306_v20 = vsel %vm1302_vm3, %v1299_v16, -inf }
 0x388   : > { %1307 = vmax.xlane.f32.xlu0 %v1306_v20  ;;  %v1654_v19 = vld [vmem:[%s6404_s6 + $0x78] sm:$0xff] }
 0x389   : > { %v1301_v21 = vadd.f32 %v5549_v0, %v1291_v18  ;;  %v1653_v18 = vld [vmem:[%s6404_s6 + $0x70] sm:$0xff] }
 0x38a   : > { %v4848_v20 = vpack.c.bf16 %v1654_v19, %v1653_v18  ;;  %v2003_v18 = vld [vmem:[%s6350_s9 + $0x18] sm:$0xff] }
 0x38b   : > { %v1312_v22 = vsel %vm1302_vm3, %v1301_v21, -inf }
 0x38c   : > { %1313 = vmax.xlane.f32.xlu1 %v1312_v22  ;;  %v1656_v22 = vld [vmem:[%s6404_s6 + $0x88] sm:$0xff] }
 0x3a1   : > { %v1305_v23 = vpop.xlane.xlu1 %1304 }
 0x3a2   : > { %v1315_v24 = vsub.f32 %v1298_v5, %v1305_v23  ;;  %v1647_v5 = vld [vmem:[%s6404_s6 + $0x40] sm:$0xff] }
 0x3a3   : > { %v4839_v9 = vpack.c.bf16 %v1648_v6, %v1647_v5 }
 0x3a4   : > { %v1319_v25 = vmul.f32 1.442695, %v1315_v24  ;;  %v1657_v24 = vld [vmem:[%s6404_s6 + $0x90] sm:$0xff] }
 0x3a5   : > { %v1311_v26 = vpop.xlane.xlu1 %1310 }
 0x3a6   : > { %5069 = vpow2.f32 %v1319_v25  ;;  %v1317_v27 = vsub.f32 %v1300_v10, %v1311_v26  ;;  %v1658_v25 = vld [vmem:[%s6404_s6 + $0x98] sm:$0xff] }
 0x3a8   : > { %v1323_v28 = vmul.f32 1.442695, %v1317_v27 }
 0x3aa   : > { %5071 = vpow2.f32 %v1323_v28  ;;  %v4854_v28 = vpack.c.bf16 %v1658_v25, %v1657_v24 }
 0x3b0   : > { %v5070_v29 = vpop.eup %5069 }
 0x3b1   : > { %v1327_v30 = vsel %vm1302_vm3, %v5070_v29, 0.0 }
 0x3b2   : > { %1328 = vadd.xlane.f32.xlu1 %v1327_v30  ;;  %v1660_v30 = vld [vmem:[%s6404_s6 + $0xa8] sm:$0xff] }
 0x3b4   : > { %v5072_v31 = vpop.eup %5071 }
 0x3b5   : > { %v1333_v32 = vsel %vm1302_vm3, %v5072_v31, 0.0 }
 0x3b6   : > { %1334 = vadd.xlane.f32.xlu0 %v1333_v32 }
 0x3cc   : > { %984 = vrot.lane.b32.xlu0 %v966_v58, %s6376_s20  ;;  %v1644_v58 = vld [vmem:[%s6404_s6 + $0x28] sm:$0xff] }
 0x415   : > { %v1308_v33 = vpop.xlane.xlu0 %1307 }
 0x416   : > { %v1316_v34 = vsub.f32 %v1299_v16, %v1308_v33  ;;  %v1652_v16 = vld [vmem:[%s6404_s6 + $0x68] sm:$0xff] }
 0x417   : > { %v4845_v17 = vpack.c.bf16 %v1652_v16, %v1651_v14  ;;  %v2000_v14 = vld [vmem:[%s6350_s9] sm:$0xff] }
 0x418   : > { %v1321_v35 = vmul.f32 1.442695, %v1316_v34  ;;  %v1661_v34 = vld [vmem:[%s6404_s6 + $0xb0] sm:$0xff] }
 0x419   : > { %v1314_v36 = vpop.xlane.xlu1 %1313 }
 0x41a   : > { %5073 = vpow2.f32 %v1321_v35  ;;  %v1318_v37 = vsub.f32 %v1301_v21, %v1314_v36  ;;  %v1655_v21 = vld [vmem:[%s6404_s6 + $0x80] sm:$0xff]  ;;  %v1662_v35 = vld [vmem:[%s6404_s6 + $0xb8] sm:$0xff] }
 0x41b   : > { %v4851_v23 = vpack.c.bf16 %v1656_v22, %v1655_v21  ;;  %v4860_v36 = vpack.c.bf16 %v1662_v35, %v1661_v34  ;;  %v2094_v21 = vld [vmem:[%s6352_s11 + $0x8] sm:$0xff]  ;;  %v2097_v35 = vld [vmem:[%s6352_s11 + $0x20] sm:$0xff] }
 0x41c   : > { %v1325_v38 = vmul.f32 1.442695, %v1318_v37  ;;  %v1663_v37 = vld [vmem:[%s6404_s6 + $0xc0] sm:$0xff] }
 0x41e   : > { %5075 = vpow2.f32 %v1325_v38  ;;  %v1664_v38 = vld [vmem:[%s6404_s6 + $0xc8] sm:$0xff] }
 0x424   : > { %v5074_v39 = vpop.eup %5073 }
 0x425   : > { %v1330_v40 = vsel %vm1302_vm3, %v5074_v39, 0.0 }
 0x426   : > { %1331 = vadd.xlane.f32.xlu1 %v1330_v40  ;;  %v1665_v40 = vld [vmem:[%s6404_s6 + $0xd0] sm:$0xff] }
 0x428   : > { %v5076_v41 = vpop.eup %5075 }
 0x429   : > { %v1336_v42 = vsel %vm1302_vm3, %v5076_v41, 0.0 }
 0x42a   : > { %1337 = vadd.xlane.f32.xlu1 %v1336_v42 }
 0x43b   : > { %988 = vrot.lane.b32.xlu1 %v5529_v59, %s6376_s20  ;;  %s6213_s20 = scalar_lea.vmem [#allocation3], %s4150_s21  ;;  %s4295_s21 = sshll.u32 %s5385_s18, 7 }
 0x43c   : > { %s3990_s24 = sshll.u32 %s6213_s20, 4  ;;  %s6237_s29 = scalar_lea.hbm %s6360_s19, %s4295_s21  ;;  %s3991_s24 = int_to_ptr.vmem [resolvable:$true] %s3990_s24 }
 0x43d   : > { %s5119_s5 = scalar_lea.vmem %s3991_s24, 128 }
 0x43e   : > { %p5120_p11 = scmp.ne.s32.totalorder %s3991_s24, %s5119_s5 }
 0x43f   : > { %v1329_v43 = vpop.xlane.xlu1 %1328 }
 0x440   : > { %5077 = vrcp.f32 %v1329_v43  ;;  %p5121_p12 = pnand %p5120_p11, %p5404_p5 }
 0x442   : > { %p5122_p13 = pneg %p5121_p12 }
 0x443   : > { %v1335_v44 = vpop.xlane.xlu0 %1334 }
 0x444   : > { %5079 = vrcp.f32 %v1335_v44 }
 0x447   : > { %v985_v45 = vpop.permute.xlu0 %984 }
 0x448   : > { %4483 = vmatpush3.msra.mxu1 %v985_v45  ;;  %v1667_v45 = vld [vmem:[%s6404_s6 + $0xe0] sm:$0xff] }
 0x449   : > { %4492 = vmatprep.subr.mxu1 %v5243_v15 }
 0x44a   : > { %v5078_v46 = vpop.eup %5077 }
 0x44b   : > { %v1343_v47 = vmul.f32 %v5078_v46, %v5070_v29  ;;  %v1659_v29 = vld [vmem:[%s6404_s6 + $0xa0] sm:$0xff]  ;;  %v1668_v46 = vld [vmem:[%s6404_s6 + $0xe8] sm:$0xff] }
 0x44c   : > { %v4857_v33 = vpack.c.bf16 %v1660_v30, %v1659_v29  ;;  %v4869_v49 = vpack.c.bf16 %v1668_v46, %v1667_v45  ;;  %v4175_v29 = vld [vmem:[%s6349_s8] ss:$0 sm:$0xff]  ;;  %v2104_v45 = vld [vmem:[%s6352_s11 + $0x58] sm:$0xff] }
 0x44d   : > { %4480 = vmatmul.mubr.msk.f32.vlgmr.msra.gmra.mrb[8].mxu0 %vm1302_vm3, %v1343_v47 }
 0x44e   : > { %v5080_v50 = vpop.eup %5079  ;;  %4488 = vmatpush3.msra.mxu0 %v5529_v59  ;;  %4489 = vmatprep.mubr.msk.f32.mxu0 %vm5244_vm1, %v5243_v15  ;;  %v4833_v59 = vpack.c.bf16 %v1644_v58, %v1643_v57 }
 0x44f   : > { %v1345_v52 = vmul.f32 %v5080_v50, %v5072_v31  ;;  %4826 = vmatprep.subr.bf16.mxu0 %v5246_v53  ;;  %v1669_v50 = vld [vmem:[%s6404_s6 + $0xf0] sm:$0xff] }
 0x451   : > { %4490 = vmatmul.mubr.msk.f32.vlgmr.msra.gmra.mrb[10].mxu0 %vm1302_vm3, %v1345_v52 }
 0x452   : > { %4828 = vmatpush3.bf16.msra.mxu0 %v4827_v51  ;;  %4513 = vmatprep.mubr.msk.f32.mxu0 %vm5244_vm1, %v5243_v15  ;;  %v1670_v51 = vld [vmem:[%s6404_s6 + $0xf8] sm:$0xff] }
 0x453   : > { %4829 = vmatprep.subr.bf16.mxu0 %v5246_v53  ;;  %v4872_v52 = vpack.c.bf16 %v1670_v51, %v1669_v50  ;;  %v2107_v50 = vld [vmem:[%s6352_s11 + $0x70] sm:$0xff]  ;;  %v2108_v51 = vld [vmem:[%s6352_s11 + $0x78] sm:$0xff] }
 0x456   : > { %4831 = vmatpush3.bf16.msra.mxu0 %v4830_v56 }
 0x457   : > { %4832 = vmatprep.subr.bf16.mxu0 %v5246_v53 }
 0x45a   : > { %4834 = vmatpush3.bf16.msra.mxu0 %v4833_v59 }
 0x45b   : > { %4835 = vmatprep.subr.bf16.mxu0 %v5246_v53 }
 0x45e   : > { %4837 = vmatpush3.bf16.msra.mxu0 %v4836_v62 }
 0x45f   : > { %4850 = vmatprep.subr.bf16.mxu0 %v5246_v53 }
 0x4b3   : > { %v1332_v63 = vpop.xlane.xlu1 %1331 }
 0x4b4   : > { %5081 = vrcp.f32 %v1332_v63 }
 0x4b7   : > { %v1338_v2 = vpop.xlane.xlu1 %1337 }
 0x4b8   : > { %5083 = vrcp.f32 %v1338_v2 }
 0x4bb   : > { %v989_v7 = vpop.permute.xlu1 %988 }
 0x4be   : > { %v5082_v3 = vpop.eup %5081 }
 0x4bf   : > { %v1344_v4 = vmul.f32 %v5082_v3, %v5074_v39  ;;  %v4863_v39 = vpack.c.bf16 %v1664_v38, %v1663_v37  ;;  %v2099_v38 = vld [vmem:[%s6352_s11 + $0x30] sm:$0xff] }
 0x4c1   : > { %4485 = vmatmul.mubr.msk.f32.vlgmr.msra.gmra.mrb[6].mxu1 %vm1302_vm3, %v1344_v4 }
 0x4c2   : > { %v5084_v8 = vpop.eup %5083  ;;  %4493 = vmatpush3.msra.mxu1 %v989_v7  ;;  %4494 = vmatprep.mubr.msk.f32.mxu1 %vm5244_vm1, %v5243_v15 }
 0x4c3   : > { %v1346_v10 = vmul.f32 %v5084_v8, %v5076_v41  ;;  %4838 = vmatprep.subr.bf16.mxu1 %v5246_v53  ;;  %v1666_v41 = vld [vmem:[%s6404_s6 + $0xd8] sm:$0xff] }
 0x4c4   : > { %v4866_v44 = vpack.c.bf16 %v1666_v41, %v1665_v40  ;;  %v2101_v41 = vld [vmem:[%s6352_s11 + $0x40] sm:$0xff] }
 0x4c5   : > { %4495 = vmatmul.mubr.msk.f32.vlgmr.msra.gmra.mrb[8].mxu1 %vm1302_vm3, %v1346_v10 }
 0x4c6   : > { %4840 = vmatpush3.bf16.msra.mxu1 %v4839_v9  ;;  %4532 = vmatprep.mubr.msk.f32.mxu1 %vm5244_vm1, %v5243_v15 }
 0x4c7   : > { %4841 = vmatprep.subr.bf16.mxu1 %v5246_v53 }
 0x4ca   : > { %4843 = vmatpush3.bf16.msra.mxu1 %v4842_v13 }
 0x4cb   : > { %4844 = vmatprep.subr.bf16.mxu1 %v5246_v53 }
 0x4ce   : > { %4846 = vmatpush3.bf16.msra.mxu1 %v4845_v17  ;;  %v2002_v17 = vld [vmem:[%s6350_s9 + $0x10] sm:$0xff] }
 0x4cf   : > { %4847 = vmatprep.subr.bf16.mxu1 %v5246_v53  ;;  %v4878_v19 = vpack.c.bf16 %v2003_v18, %v2002_v17  ;;  %v4184_v17 = vld [vmem:[%s6400_s0 + $0xc8] sm:$0xff] }
 0x4d2   : > { %4849 = vmatpush3.bf16.msra.mxu1 %v4848_v20  ;;  %v2093_v20 = vld [vmem:[%s6352_s11] sm:$0xff] }
 0x4d3   : > { %4862 = vmatprep.subr.bf16.mxu1 %v5246_v53  ;;  %v4881_v22 = vpack.c.bf16 %v2094_v21, %v2093_v20  ;;  %v4189_v20 = vld [vmem:[%s6400_s0 + $0xf0] sm:$0xff] }
 0x520   : > { %v1416_v26 = vpop.f32.mrb[8].mxu0 }
 0x521   : > { %v4481_v27 = vpop.f32.mrb[9].mxu0  ;;  %4514 = vmatmul.mubr.msk.f32.vlgmr.msra.gmra.mrb[12].mxu0 %vm991_vm2, %v1416_v26 }
 0x522   : > { %4852 = vmatpush3.bf16.msra.mxu0 %v4851_v23  ;;  %4551 = vmatprep.mubr.msk.f32.mxu0 %vm5244_vm1, %v5243_v15  ;;  %v4174_v27 = vld [vmem:[%s6405_s7] ss:$0 sm:$0xff] }
 0x523   : > { %4853 = vmatprep.subr.bf16.mxu0 %v5246_v53 }
 0x524   : > { %v1562_v31 = vpop.f32.mrb[10].mxu0 }
 0x525   : > { %v4491_v32 = vpop.f32.mrb[11].mxu0 }
 0x526   : > { %4855 = vmatpush3.bf16.msra.mxu0 %v4854_v28  ;;  %v2095_v32 = vld [vmem:[%s6352_s11 + $0x10] sm:$0xff] }
 0x527   : > { %4856 = vmatprep.subr.bf16.mxu0 %v5246_v53 }
 0x52a   : > { %4858 = vmatpush3.bf16.msra.mxu0 %v4857_v33  ;;  %v2096_v33 = vld [vmem:[%s6352_s11 + $0x18] sm:$0xff] }
 0x52b   : > { %4859 = vmatprep.subr.bf16.mxu0 %v5246_v53  ;;  %v4884_v34 = vpack.c.bf16 %v2096_v33, %v2095_v32 }
 0x52e   : > { %4861 = vmatpush3.bf16.msra.mxu0 %v4860_v36  ;;  %v2098_v36 = vld [vmem:[%s6352_s11 + $0x28] sm:$0xff] }
 0x52f   : > { %4874 = vmatprep.subr.bf16.mxu0 %v5246_v53  ;;  %v4887_v37 = vpack.c.bf16 %v2098_v36, %v2097_v35  ;;  %v4181_v35 = vld [vmem:[%s6401_s23 + $0x1] ss:$0 sm:$0xff] }
 0x531   : > { %4552 = vmatmul.mubr.msk.f32.vlgmr.msra.gmra.mrb[14].mxu0 %vm991_vm2, %v1562_v31 }
 0x532   : > { %4581 = vmatprep.mubr.msk.f32.mxu0 %vm5244_vm1, %v5243_v15 }
 0x594   : > { %v1489_v42 = vpop.f32.mrb[6].mxu1 }
 0x595   : > { %v4486_v43 = vpop.f32.mrb[7].mxu1  ;;  %4533 = vmatmul.mubr.msk.f32.vlgmr.msra.gmra.mrb[10].mxu1 %vm991_vm2, %v1489_v42  ;;  %v2102_v42 = vld [vmem:[%s6352_s11 + $0x48] sm:$0xff] }
 0x596   : > { %4864 = vmatpush3.bf16.msra.mxu1 %v4863_v39  ;;  %4570 = vmatprep.mubr.msk.f32.mxu1 %vm5244_vm1, %v5243_v15  ;;  %v2100_v39 = vld [vmem:[%s6352_s11 + $0x38] sm:$0xff]  ;;  %v4893_v43 = vpack.c.bf16 %v2102_v42, %v2101_v41  ;;  %v4204_v41 = vld [vmem:[%s6400_s0 + $0x168] sm:$0xff] }
 0x597   : > { %4865 = vmatprep.subr.bf16.mxu1 %v5246_v53  ;;  %v4890_v40 = vpack.c.bf16 %v2100_v39, %v2099_v38  ;;  %v4191_v38 = vld [vmem:[%s6400_s0 + $0x100] sm:$0xff] }
 0x598   : > { %v1635_v47 = vpop.f32.mrb[8].mxu1  ;;  %v4182_v39 = vld [vmem:[%s6402_s4 + $0x1] ss:$0 sm:$0xff] }
 0x599   : > { %v4496_v48 = vpop.f32.mrb[9].mxu1 }
 0x59a   : > { %4867 = vmatpush3.bf16.msra.mxu1 %v4866_v44  ;;  %v2103_v44 = vld [vmem:[%s6352_s11 + $0x50] sm:$0xff]  ;;  %v2106_v48 = vld [vmem:[%s6352_s11 + $0x68] sm:$0xff] }
 0x59b   : > { %4868 = vmatprep.subr.bf16.mxu1 %v5246_v53  ;;  %v4896_v46 = vpack.c.bf16 %v2104_v45, %v2103_v44 }
 0x59e   : > { %4870 = vmatpush3.bf16.msra.mxu1 %v4869_v49 }
 0x59f   : > { %4871 = vmatprep.subr.bf16.mxu1 %v5246_v53 }
 0x5a2   : > { %4873 = vmatpush3.bf16.msra.mxu1 %v4872_v52  ;;  %v4902_v52 = vpack.c.bf16 %v2108_v51, %v2107_v50 }
 0x5a3   : > { %4880 = vmatprep.subr.bf16.mxu1 %v5246_v53 }
 0x5a5   : > { %4571 = vmatmul.mubr.msk.f32.vlgmr.msra.gmra.mrb[12].mxu1 %vm991_vm2, %v1635_v47  ;;  %v2105_v47 = vld [vmem:[%s6352_s11 + $0x60] sm:$0xff] }
 0x5a6   : > { %4616 = vmatprep.mubr.msk.f32.mxu1 %vm5244_vm1, %v5243_v15  ;;  %4882 = vmatpush3.bf16.msra.mxu1 %v4881_v22  ;;  %v4899_v49 = vpack.c.bf16 %v2106_v48, %v2105_v47  ;;  %v4196_v22 = vld [vmem:[%s6400_s0 + $0x128] sm:$0xff]  ;;  %v4203_v47 = vld [vmem:[%s6400_s0 + $0x160] sm:$0xff] }
 0x5a7   : > { %4883 = vmatprep.subr.bf16.mxu1 %v5246_v53  ;;  %v4188_v48 = vld [vmem:[%s6400_s0 + $0xe8] sm:$0xff] }
 0x5aa   : > { %4885 = vmatpush3.bf16.msra.mxu1 %v4884_v34 }
 0x5ab   : > { %4886 = vmatprep.subr.bf16.mxu1 %v5246_v53 }
 0x5ae   : > { %4888 = vmatpush3.bf16.msra.mxu1 %v4887_v37  ;;  %v4185_v37 = vld [vmem:[%s6400_s0 + $0xd0] sm:$0xff] }
 0x5af   : > { %4889 = vmatprep.subr.bf16.mxu1 %v5246_v53 }
 0x5b2   : > { %4891 = vmatpush3.bf16.msra.mxu1 %v4890_v40  ;;  %v4198_v40 = vld [vmem:[%s6400_s0 + $0x138] sm:$0xff] }
 0x5b3   : > { %4892 = vmatprep.subr.bf16.mxu1 %v5246_v53  ;;  %v4916_v45 = vpack.c.bf16 %v4204_v41, %v4198_v40 }
 0x5b6   : > { %4894 = vmatpush3.bf16.msra.mxu1 %v4893_v43  ;;  %v4914_v43 = vpack.c.bf16 %v4191_v38, %v4185_v37 }
 0x5b7   : > { %4895 = vmatprep.subr.bf16.mxu1 %v5246_v53 }
 0x5ba   : > { %4897 = vmatpush3.bf16.msra.mxu1 %v4896_v46  ;;  %v4197_v46 = vld [vmem:[%s6400_s0 + $0x130] sm:$0xff] }
 0x5bb   : > { %4898 = vmatprep.subr.bf16.mxu1 %v5246_v53  ;;  %v4918_v50 = vpack.c.bf16 %v4203_v47, %v4197_v46 }
 0x5be   : > { %4900 = vmatpush3.bf16.msra.mxu1 %v4899_v49  ;;  %v4194_v49 = vld [vmem:[%s6400_s0 + $0x118] sm:$0xff] }
 0x5bf   : > { %4901 = vmatprep.subr.bf16.mxu1 %v5246_v53  ;;  %v4920_v51 = vpack.c.bf16 %v4194_v49, %v4188_v48 }
 0x5c2   : > { %4903 = vmatpush3.bf16.msra.mxu1 %v4902_v52  ;;  %v4187_v52 = vld [vmem:[%s6400_s0 + $0xe0] sm:$0xff] }
 0x5c3   : > { %4624 = vmatprep.subr.mxu1 %v5243_v15 }
 0x5f4   : > { %v1740_v54 = vpop.f32.mrb[12].mxu0 }
 0x5f5   : > { %v4515_v55 = vpop.f32.mrb[13].mxu0  ;;  %v1963_v59 = vsel %vm702_vm0, %v1740_v54, 0.0  ;;  %v4176_v54 = vld [vmem:[%s6351_s10] ss:$0 sm:$0xff] }
 0x604   : > { %v1886_v56 = vpop.f32.mrb[14].mxu0 }
 0x605   : > { %v4553_v57 = vpop.f32.mrb[15].mxu0  ;;  %v1966_v63 = vsel %vm702_vm0, %v1886_v56, 0.0 }
 0x668   : > { %v1813_v58 = vpop.f32.mrb[10].mxu1 }
 0x669   : > { %v1964_v60 = vsel %vm702_vm0, %v1813_v58, 0.0  ;;  %v4534_v61 = vpop.f32.mrb[11].mxu1 }
 0x66a   : > { %v1965_v62 = vadd.f32 %v1964_v60, %v1963_v59 }
 0x66c   : > { %v1967_v2 = vadd.f32 %v1966_v63, %v1965_v62 }
 0x678   : > { %v1959_v3 = vpop.f32.mrb[12].mxu1 }
 0x679   : > { %v1968_v4 = vsel %vm702_vm0, %v1959_v3, 0.0  ;;  %v4572_v5 = vpop.f32.mrb[13].mxu1 }
 0x67a   : > { %v1969_v6 = vadd.f32 %v1968_v4, %v1967_v2 }
 0x67c   : > { %v5711_v7 = vadd.f32 %v1969_v6, %v5422_v1  ;;  %v2001_v1 = vld [vmem:[%s6350_s9 + $0x8] sm:$0xff]  ;;  %v4178_v6 = vld [vmem:[%s6353_s12] ss:$0 sm:$0xff] }
 0x67d   : > { %v4875_v16 = vpack.c.bf16 %v2001_v1, %v2000_v14 }
 0x67e   : > { %v1973_v8 = vsel %vm702_vm0, %v5711_v7, 0.0 }
 0x67f   : > { %1974 = vadd.xlane.f32.xlu1 %v1973_v8  ;;  %4876 = vmatpush3.bf16.msra.mxu0 %v4875_v16 }
 0x680   : > { %4877 = vmatprep.subr.bf16.mxu0 %v5246_v53 }
 0x683   : > { %4879 = vmatpush3.bf16.msra.mxu0 %v4878_v19  ;;  %v4183_v19 = vld [vmem:[%s6400_s0 + $0xc0] sm:$0xff] }
 0x684   : > { %v4906_v21 = vpack.c.bf16 %v4189_v20, %v4183_v19 }
 0x70c   : > { %v1975_v9 = vpop.xlane.xlu1 %1974 }
 0x70d   : > { %v1976_v10 = vmul.f32 0.03125, %v1975_v9 }
 0x70f   : > { %v1977_v11 = vsub.f32 %v5711_v7, %v1976_v10 }
 0x711   : > { %v1978_v12 = vmul.f32 %v1977_v11, %v1977_v11 }
 0x713   : > { %v1979_v13 = vsel %vm702_vm0, %v1978_v12, 0.0 }
 0x714   : > { %1980 = vadd.xlane.f32.xlu0 %v1979_v13 }
 0x7a1   : > { %v1981_v23 = vpop.xlane.xlu0 %1980 }
 0x7a2   : > { %v1982_v24 = vmul.f32 0.03125, %v1981_v23  ;;  %v4202_v23 = vld [vmem:[%s6400_s0 + $0x158] sm:$0xff] }
 0x7a4   : > { %v1983_v25 = vadd.f32 1e-05, %v1982_v24  ;;  %v4908_v24 = vpack.c.bf16 %v4202_v23, %v4196_v22 }
 0x7a6   : > { %5085 = vrsqrt.f32 %v1983_v25  ;;  %v4195_v25 = vld [vmem:[%s6400_s0 + $0x120] sm:$0xff] }
 0x7b0   : > { %v5086_v26 = vpop.eup %5085 }
 0x7b1   : > { %v1985_v28 = vmul.f32 %v5086_v26, %v1977_v11  ;;  %v4201_v26 = vld [vmem:[%s6400_s0 + $0x150] sm:$0xff] }
 0x7b3   : > { %v1992_v30 = vmul.f32 %v4174_v27, %v1985_v28  ;;  %v4910_v27 = vpack.c.bf16 %v4201_v26, %v4195_v25  ;;  %v4186_v28 = vld [vmem:[%s6400_s0 + $0xd8] sm:$0xff] }
 0x7b5   : > { %v1999_v31 = vadd.f32 %v4175_v29, %v1992_v30  ;;  %v4192_v29 = vld [vmem:[%s6400_s0 + $0x108] sm:$0xff] }
 0x7b6   : > { %v4912_v30 = vpack.c.bf16 %v4192_v29, %v4186_v28 }
 0x7b7   : > { %4582 = vmatmul.mubr.msk.f32.vlgmr.msra.gmra.mrb[16].mxu0 %vm702_vm0, %v1999_v31 }
 0x7b8   : > { %2311 = vmatprep.mubr.f32.mxu0 %v5243_v15 }
 0x88a   : > { %v2080_v55 = vpop.f32.mrb[16].mxu0 }
 0x88b   : > { %v2081_v56 = vadd.f32 %v4176_v54, %v2080_v55  ;;  %v4583_v57 = vpop.f32.mrb[17].mxu0  ;;  %v4193_v54 = vld [vmem:[%s6400_s0 + $0x110] sm:$0xff]  ;;  %v4200_v55 = vld [vmem:[%s6400_s0 + $0x148] sm:$0xff] }
 0x88c   : > { %v4922_v57 = vpack.c.bf16 %v4193_v54, %v4187_v52 }
 0x88d   : > { %v2084_v58 = vmul.f32 %v2081_v56, %v2081_v56 }
 0x88f   : > { %v2085_v59 = vmul.f32 %v2084_v58, %v2081_v56 }
 0x891   : > { %v2086_v60 = vmul.f32 0.044715, %v2085_v59  ;;  %v4199_v59 = vld [vmem:[%s6400_s0 + $0x140] sm:$0xff] }
 0x893   : > { %v2087_v61 = vadd.f32 %v2086_v60, %v2081_v56  ;;  %v4205_v60 = vld [vmem:[%s6400_s0 + $0x170] sm:$0xff] }
 0x895   : > { %v2088_v62 = vmul.f32 0.7978846, %v2087_v61  ;;  %v4926_v61 = vpack.c.bf16 %v4205_v60, %v4199_v59  ;;  %v4230_v60 = vld [vmem:[%s6404_s6 + $0x140] sm:$0xff] }
 0x897   : > { %5087 = vtanh.f32 %v2088_v62 }
 0x8a1   : > { %v5088_v63 = vpop.eup %5087 }
 0x8a2   : > { %v2090_v2 = vadd.f32 1.0, %v5088_v63 }
 0x8a4   : > { %v2091_v3 = vmul.f32 0.5, %v2090_v2 }
 0x8a6   : > { %v2092_v4 = vmul.f32 %v2091_v3, %v2081_v56  ;;  %v4206_v56 = vld [vmem:[%s6400_s0 + $0x178] sm:$0xff] }
 0x8a7   : > { %v4924_v58 = vpack.c.bf16 %v4206_v56, %v4200_v55 }
 0x8a8   : > { %4617 = vmatmul.mubr.f32.vlgmr.msra.gmra.mrb[14].mxu1 %v2092_v4 }
 0x8a9   : > { %4626 = vmatprep.mubr.msk.f32.mxu1 %vm5244_vm1, %v5243_v15 }
 0x97b   : > { %v2175_v5 = vpop.f32.mrb[14].mxu1 }
 0x97c   : > { %v2179_v8 = vadd.f32 %v2175_v5, %v5711_v7  ;;  %v4618_v9 = vpop.f32.mrb[15].mxu1  ;;  %v4190_v7 = vld [vmem:[%s6400_s0 + $0xf8] sm:$0xff] }
 0x97d   : > { %v4904_v18 = vpack.c.bf16 %v4190_v7, %v4184_v17 }
 0x97e   : > { %v5803_v10 = vadd.f32 %v4178_v6, %v2179_v8 }
 0x97f   : > { %4905 = vmatprep.subr.bf16.mxu0 %v4904_v18 }
 0x980   : > { %v2192_v11 = vsel %vm702_vm0, %v5803_v10, 0.0  ;;  %4907 = vmatpush1.bf16.msra.mxu0 %v4906_v21 }
 0x981   : > { %2193 = vadd.xlane.f32.xlu0 %v2192_v11  ;;  %4909 = vmatprep.subr.bf16.mxu0 %v4908_v24 }
 0x984   : > { %4911 = vmatpush1.bf16.msra.mxu0 %v4910_v27 }
 0x985   : > { %4913 = vmatprep.subr.bf16.mxu0 %v4912_v30 }
 0xa0e   : > { %v2194_v12 = vpop.xlane.xlu0 %2193 }
 0xa0f   : > { %v2195_v13 = vmul.f32 0.03125, %v2194_v12 }
 0xa11   : > { %v2196_v14 = vsub.f32 %v5803_v10, %v2195_v13 }
 0xa13   : > { %v2197_v1 = vmul.f32 %v2196_v14, %v2196_v14 }
 0xa15   : > { %v2198_v16 = vsel %vm702_vm0, %v2197_v1, 0.0 }
 0xa16   : > { %2199 = vadd.xlane.f32.xlu1 %v2198_v16 }
 0xaa3   : > { %v2200_v31 = vpop.xlane.xlu1 %2199 }
 0xaa4   : > { %v2201_v32 = vmul.f32 0.03125, %v2200_v31 }
 0xaa6   : > { %v2202_v33 = vadd.f32 1e-05, %v2201_v32 }
 0xaa8   : > { %5089 = vrsqrt.f32 %v2202_v33 }
 0xab2   : > { %v5090_v34 = vpop.eup %5089 }
 0xab3   : > { %v2204_v36 = vmul.f32 %v5090_v34, %v2196_v14 }
 0xab5   : > { %v2211_v42 = vmul.f32 %v4181_v35, %v2204_v36 }
 0xab7   : > { %v2218_v44 = vadd.f32 %v4182_v39, %v2211_v42 }
 0xab9   : > { %4207 = vmatmul.mubr.msk.f32.vlgmr.msra.gmra.mrb[18].mxu0 %vm702_vm0, %v2218_v44 }
 0xaba   : > { %4915 = vmatpush1.bf16.msra.mxu0 %v4914_v43  ;;  %2382 = vmatprep.mubr.f32.mxu0 %v5243_v15 }
 0xabb   : > { %4917 = vmatprep.subr.bf16.mxu0 %v4916_v45 }
 0xabe   : > { %4919 = vmatpush1.bf16.msra.mxu0 %v4918_v50 }
 0xabf   : > { %4921 = vmatprep.subr.bf16.mxu0 %v4920_v51 }
 0xac1   : > { %4208 = vmatmul.mubr.msk.f32.vlgmr.msra.gmra.mrb[20].mxu0 %vm702_vm0, %v2218_v44 }
 0xac2   : > { %4923 = vmatpush1.bf16.msra.mxu0 %v4922_v57  ;;  %2453 = vmatprep.mubr.f32.mxu0 %v5243_v15 }
 0xac3   : > { %4925 = vmatprep.subr.bf16.mxu0 %v4924_v58 }
 0xac6   : > { %4927 = vmatpush1.bf16.msra.mxu0 %v4926_v61  ;;  %v4231_v61 = vld [vmem:[%s6404_s6 + $0x148] sm:$0xff] }
 0xac7   : > { %4619 = vmatprep.subr.mxu0 %v5243_v15 }
 0xac9   : > { %4209 = vmatmul.mubr.msk.f32.vlgmr.msra.gmra.mrb[22].mxu0 %vm702_vm0, %v2218_v44 }
 0xaca   : > { %4621 = vmatprep.mubr.msk.f32.mxu0 %vm5244_vm1, %v5243_v15 }
 0xb8c   : > { %v2313_v62 = vpop.f32.mrb[18].mxu0 }
 0xb8d   : > { %2461 = vrot.lane.b32.xlu1 %v2313_v62, %s6406_s3  ;;  %v2315_v63 = vpop.f32.mrb[19].mxu0 }
 0xb94   : > { %v2384_v2 = vpop.f32.mrb[20].mxu0 }
 0xb95   : > { %2467 = vrot.lane.b32.xlu0 %v2384_v2, %s6406_s3  ;;  %v2386_v3 = vpop.f32.mrb[21].mxu0  ;;  %4620 = vmatpush3.xpose.msk.msra.mxu0 %vm991_vm2, %v2384_v2 }
 0xb96   : > { %2470 = vrot.lane.b32.xlu1 %v2386_v3, %s6406_s3  ;;  %4629 = vmatprep.subr.mxu0 %v5243_v15 }
 0xb98   : > { %4622 = vmatmul.mubr.msk.f32.vlgmr.msra.gmra.mrb[24].mxu0 %vm991_vm2, %v2313_v62  ;;  %v4222_v62 = vld [vmem:[%s6404_s6 + $0x100] sm:$0xff] }
 0xb99   : > { %2464 = vrot.lane.b32.xlu0 %v2315_v63, %s6406_s3  ;;  %4630 = vmatpush3.xpose.msk.msra.mxu0 %vm991_vm2, %v2386_v3 }
 0xb9a   : > { %4631 = vmatprep.mubr.msk.f32.mxu0 %vm5244_vm1, %v5243_v15  ;;  %4639 = vmatprep.subr.mxu0 %v5243_v15 }
 0xb9c   : > { %v5906_v4 = vpop.f32.mrb[22].mxu0  ;;  %4632 = vmatmul.mubr.msk.f32.vlgmr.msra.gmra.mrb[26].mxu0 %vm991_vm2, %v2315_v63  ;;  %v4223_v63 = vld [vmem:[%s6404_s6 + $0x108] sm:$0xff] }
 0xb9d   : > { %v5909_v5 = vpop.f32.mrb[23].mxu0  ;;  %4640 = vmatpush3.msra.mxu0 %v5906_v4  ;;  %4641 = vmatprep.mubr.msk.f32.mxu0 %vm5244_vm1, %v5243_v15 }
 0xb9e   : > { %4649 = vmatprep.subr.mxu0 %v5243_v15 }
 0xbff   : > { %v2462_v6 = vpop.permute.xlu1 %2461 }
 0xc07   : > { %v2468_v8 = vpop.permute.xlu0 %2467 }
 0xc08   : > { %4625 = vmatpush3.xpose.msk.msra.mxu1 %vm991_vm2, %v2468_v8  ;;  %v2471_v9 = vpop.permute.xlu1 %2470  ;;  %v4929_v8 = vpack.c.bf16 %v4223_v63, %v4222_v62 }
 0xc09   : > { %4634 = vmatprep.subr.mxu1 %v5243_v15 }
 0xc0b   : > { %4627 = vmatmul.mubr.msk.f32.vlgmr.msra.gmra.mrb[16].mxu1 %vm991_vm2, %v2462_v6  ;;  %v2465_v11 = vpop.permute.xlu0 %2464 }
 0xc0c   : > { %4635 = vmatpush3.xpose.msk.msra.mxu1 %vm991_vm2, %v2471_v9  ;;  %4636 = vmatprep.mubr.msk.f32.mxu1 %vm5244_vm1, %v5243_v15  ;;  %v4232_v9 = vld [vmem:[%s6404_s6 + $0x150] sm:$0xff] }
 0xc0d   : > { %4644 = vmatprep.subr.mxu1 %v5243_v15 }
 0xc0f   : > { %4637 = vmatmul.mubr.msk.f32.vlgmr.msra.gmra.mrb[18].mxu1 %vm991_vm2, %v2465_v11  ;;  %v4233_v11 = vld [vmem:[%s6404_s6 + $0x158] sm:$0xff] }
 0xc10   : > { %4646 = vmatprep.mubr.msk.f32.mxu1 %vm5244_vm1, %v5243_v15 }
 0xc6b   : > { %v2550_v12 = vpop.f32.mrb[24].mxu0 }
 0xc6c   : > { %v2776_v13 = vmul.f32 0.125, %v2550_v12  ;;  %v4623_v14 = vpop.f32.mrb[25].mxu0 }
 0xc6d   : > { %v4225_v14 = vld [vmem:[%s6404_s6 + $0x118] sm:$0xff] }
 0xc6e   : > { %v2780_v1 = vadd.f32 %v5549_v0, %v2776_v13  ;;  %v4224_v13 = vld [vmem:[%s6404_s6 + $0x110] sm:$0xff] }
 0xc6f   : > { %v2698_v16 = vpop.f32.mrb[26].mxu0 }
 0xc70   : > { %v4633_v17 = vpop.f32.mrb[27].mxu0  ;;  %v2784_v7 = vsel %vm1302_vm3, %v2780_v1, -inf  ;;  %v2778_v19 = vmul.f32 0.125, %v2698_v16  ;;  %v4932_v16 = vpack.c.bf16 %v4225_v14, %v4224_v13 }
 0xc71   : > { %2785 = vmax.xlane.f32.xlu1 %v2784_v7  ;;  %v4234_v17 = vld [vmem:[%s6404_s6 + $0x160] sm:$0xff]  ;;  %v4235_v7 = vld [vmem:[%s6404_s6 + $0x168] sm:$0xff] }
 0xc72   : > { %v2782_v27 = vadd.f32 %v5549_v0, %v2778_v19  ;;  %v4227_v19 = vld [vmem:[%s6404_s6 + $0x128] sm:$0xff] }
 0xc74   : > { %v2790_v30 = vsel %vm1302_vm3, %v2782_v27, -inf }
 0xcde   : > { %v2624_v18 = vpop.f32.mrb[16].mxu1 }
 0xcdf   : > { %v2777_v20 = vmul.f32 0.125, %v2624_v18  ;;  %v4628_v21 = vpop.f32.mrb[17].mxu1  ;;  %v4226_v18 = vld [vmem:[%s6404_s6 + $0x120] sm:$0xff] }
 0xce0   : > { %v4935_v21 = vpack.c.bf16 %v4227_v19, %v4226_v18 }
 0xce1   : > { %v2781_v22 = vadd.f32 %v5549_v0, %v2777_v20  ;;  %v4947_v20 = vpack.c.bf16 %v4235_v7, %v4234_v17 }
 0xce2   : > { %v2772_v23 = vpop.f32.mrb[18].mxu1 }
 0xce3   : > { %v2779_v24 = vmul.f32 0.125, %v2772_v23  ;;  %v4638_v25 = vpop.f32.mrb[19].mxu1  ;;  %v2787_v26 = vsel %vm1302_vm3, %v2781_v22, -inf  ;;  %v4237_v23 = vld [vmem:[%s6404_s6 + $0x178] sm:$0xff] }
 0xce4   : > { %2788 = vmax.xlane.f32.xlu0 %v2787_v26  ;;  %v4229_v25 = vld [vmem:[%s6404_s6 + $0x138] sm:$0xff] }
 0xce5   : > { %v2783_v28 = vadd.f32 %v5549_v0, %v2779_v24  ;;  %v4228_v24 = vld [vmem:[%s6404_s6 + $0x130] sm:$0xff] }
 0xce7   : > { %v2793_v29 = vsel %vm1302_vm3, %v2783_v28, -inf }
 0xce8   : > { %2794 = vmax.xlane.f32.xlu1 %v2793_v29  ;;  %2791 = vmax.xlane.f32.xlu0 %v2790_v30  ;;  %v4239_v29 = vld [vmem:[%s6404_s6 + $0x188] sm:$0xff] }
 0xcfe   : > { %v2786_v31 = vpop.xlane.xlu1 %2785 }
 0xcff   : > { %v2796_v32 = vsub.f32 %v2780_v1, %v2786_v31  ;;  %v4944_v1 = vpack.c.bf16 %v4233_v11, %v4232_v9  ;;  %v4240_v31 = vld [vmem:[%s6404_s6 + $0x190] sm:$0xff] }
 0xd01   : > { %v2800_v33 = vmul.f32 1.442695, %v2796_v32  ;;  %v4241_v32 = vld [vmem:[%s6404_s6 + $0x198] sm:$0xff] }
 0xd03   : > { %5091 = vpow2.f32 %v2800_v33 }
 0xd0d   : > { %v5092_v34 = vpop.eup %5091 }
 0xd0e   : > { %v2808_v35 = vsel %vm1302_vm3, %v5092_v34, 0.0 }
 0xd0f   : > { %2809 = vadd.xlane.f32.xlu0 %v2808_v35  ;;  %v4956_v35 = vpack.c.bf16 %v4241_v32, %v4240_v31 }
 0xd71   : > { %v2789_v36 = vpop.xlane.xlu0 %2788 }
 0xd72   : > { %v2797_v37 = vsub.f32 %v2781_v22, %v2789_v36  ;;  %v4236_v22 = vld [vmem:[%s6404_s6 + $0x170] sm:$0xff]  ;;  %v4242_v36 = vld [vmem:[%s6404_s6 + $0x1a0] sm:$0xff] }
 0xd73   : > { %v4950_v26 = vpack.c.bf16 %v4237_v23, %v4236_v22  ;;  %v4264_v23 = vld [vmem:[%s6350_s9 + $0x30] sm:$0xff] }
 0xd74   : > { %v2802_v38 = vmul.f32 1.442695, %v2797_v37  ;;  %v4243_v37 = vld [vmem:[%s6404_s6 + $0x1a8] sm:$0xff] }
 0xd75   : > { %v2795_v39 = vpop.xlane.xlu1 %2794  ;;  %v2792_v40 = vpop.xlane.xlu0 %2791 }
 0xd76   : > { %5093 = vpow2.f32 %v2802_v38  ;;  %v2799_v0 = vsub.f32 %v2783_v28, %v2795_v39  ;;  %v2798_v41 = vsub.f32 %v2782_v27, %v2792_v40  ;;  %v4938_v27 = vpack.c.bf16 %v4229_v25, %v4228_v24  ;;  %v4238_v28 = vld [vmem:[%s6404_s6 + $0x180] sm:$0xff]  ;;  %v4244_v39 = vld [vmem:[%s6404_s6 + $0x1b0] sm:$0xff]  ;;  %v4245_v40 = vld [vmem:[%s6404_s6 + $0x1b8] sm:$0xff] }
 0xd77   : > { %v4953_v30 = vpack.c.bf16 %v4239_v29, %v4238_v28  ;;  %v4959_v38 = vpack.c.bf16 %v4243_v37, %v4242_v36  ;;  %v4265_v24 = vld [vmem:[%s6350_s9 + $0x38] sm:$0xff] }
 0xd78   : > { %v2806_v42 = vmul.f32 1.442695, %v2799_v0  ;;  %v2804_v43 = vmul.f32 1.442695, %v2798_v41  ;;  %v4962_v0 = vpack.c.bf16 %v4245_v40, %v4244_v39  ;;  %v4246_v41 = vld [vmem:[%s6404_s6 + $0x1c0] sm:$0xff]  ;;  %v4980_v25 = vpack.c.bf16 %v4265_v24, %v4264_v23  ;;  %v4272_v39 = vld [vmem:[%s6352_s11 + $0x98] sm:$0xff] }
 0xd79   : > { %v3707_v24 = vld [vmem:[%s6356_s15 + $0x10] sm:$0xff] }
 0xd7a   : > { %5095 = vpow2.f32 %v2806_v42  ;;  %v4247_v42 = vld [vmem:[%s6404_s6 + $0x1c8] sm:$0xff] }
 0xd7b   : > { %5097 = vpow2.f32 %v2804_v43  ;;  %v4965_v43 = vpack.c.bf16 %v4247_v42, %v4246_v41  ;;  %v4274_v41 = vld [vmem:[%s6352_s11 + $0xa8] sm:$0xff] }
 0xd80   : > { %v5094_v44 = vpop.eup %5093 }
 0xd81   : > { %v2811_v45 = vsel %vm1302_vm3, %v5094_v44, 0.0 }
 0xd82   : > { %2812 = vadd.xlane.f32.xlu1 %v2811_v45  ;;  %v4249_v45 = vld [vmem:[%s6404_s6 + $0x1d8] sm:$0xff] }
 0xd84   : > { %v5096_v46 = vpop.eup %5095 }
 0xd85   : > { %v5098_v47 = vpop.eup %5097  ;;  %v2817_v48 = vsel %vm1302_vm3, %v5096_v46, 0.0 }
 0xd86   : > { %2818 = vadd.xlane.f32.xlu1 %v2817_v48  ;;  %v2814_v49 = vsel %vm1302_vm3, %v5098_v47, 0.0 }
 0xd87   : > { %2815 = vadd.xlane.f32.xlu0 %v2814_v49  ;;  %v4250_v49 = vld [vmem:[%s6404_s6 + $0x1e0] sm:$0xff] }
 0xd97   : > { %2477 = vrot.lane.b32.xlu1 %v5909_v5, %s6406_s3 }
 0xd9c   : > { %v2810_v50 = vpop.xlane.xlu0 %2809 }
 0xd9d   : > { %2473 = vrot.lane.b32.xlu0 %v5906_v4, %s6406_s3  ;;  %5099 = vrcp.f32 %v2810_v50  ;;  %v4941_v4 = vpack.c.bf16 %v4231_v61, %v4230_v60  ;;  %v4251_v50 = vld [vmem:[%s6404_s6 + $0x1e8] sm:$0xff]  ;;  %s3969_s3 = scalar_lea.sflag [#allocation4], %s6203_s28 }
 0xda7   : > { %v5100_v51 = vpop.eup %5099 }
 0xda8   : > { %v2824_v52 = vmul.f32 %v5100_v51, %v5092_v34 }
 0xdaa   : > { %4642 = vmatmul.mubr.msk.f32.vlgmr.msra.gmra.mrb[28].mxu0 %vm1302_vm3, %v2824_v52 }
 0xdab   : > { %4650 = vmatpush3.msra.mxu0 %v5909_v5  ;;  %4651 = vmatprep.mubr.msk.f32.mxu0 %vm5244_vm1, %v5243_v15 }
 0xdac   : > { %4928 = vmatprep.subr.bf16.mxu0 %v5246_v53 }
 0xe0f   : > { %v2813_v54 = vpop.xlane.xlu1 %2812 }
 0xe10   : > { %5101 = vrcp.f32 %v2813_v54 }
 0xe13   : > { %v2819_v55 = vpop.xlane.xlu1 %2818 }
 0xe14   : > { %5103 = vrcp.f32 %v2819_v55  ;;  %v2816_v56 = vpop.xlane.xlu0 %2815 }
 0xe15   : > { %5105 = vrcp.f32 %v2816_v56  ;;  %v4971_v56 = vpack.c.bf16 %v4251_v50, %v4250_v49  ;;  %v4279_v49 = vld [vmem:[%s6352_s11 + $0xd0] sm:$0xff]  ;;  %v4280_v50 = vld [vmem:[%s6352_s11 + $0xd8] sm:$0xff] }
 0xe17   : > { %v2478_v2 = vpop.permute.xlu1 %2477 }
 0xe18   : > { %v2474_v57 = vpop.permute.xlu0 %2473 }
 0xe19   : > { %4645 = vmatpush3.msra.mxu1 %v2474_v57  ;;  %v4252_v57 = vld [vmem:[%s6404_s6 + $0x1f0] sm:$0xff] }
 0xe1a   : > { %v5102_v58 = vpop.eup %5101  ;;  %4654 = vmatprep.subr.mxu1 %v5243_v15 }
 0xe1b   : > { %v2825_v59 = vmul.f32 %v5102_v58, %v5094_v44  ;;  %v4248_v44 = vld [vmem:[%s6404_s6 + $0x1d0] sm:$0xff]  ;;  %v4253_v58 = vld [vmem:[%s6404_s6 + $0x1f8] sm:$0xff] }
 0xe1c   : > { %v4968_v48 = vpack.c.bf16 %v4249_v45, %v4248_v44  ;;  %v4276_v44 = vld [vmem:[%s6352_s11 + $0xb8] sm:$0xff] }
 0xe1d   : > { %4647 = vmatmul.mubr.msk.f32.vlgmr.msra.gmra.mrb[20].mxu1 %vm1302_vm3, %v2825_v59  ;;  %v4974_v59 = vpack.c.bf16 %v4253_v58, %v4252_v57  ;;  %v4284_v57 = vld [vmem:[%s6352_s11 + $0xf8] sm:$0xff] }
 0xe1e   : > { %v5104_v3 = vpop.eup %5103  ;;  %4655 = vmatpush3.msra.mxu1 %v2478_v2  ;;  %4656 = vmatprep.mubr.msk.f32.mxu1 %vm5244_vm1, %v5243_v15 }
 0xe1f   : > { %v5106_v5 = vpop.eup %5105  ;;  %v2827_v6 = vmul.f32 %v5104_v3, %v5096_v46  ;;  %4940 = vmatprep.subr.bf16.mxu1 %v5246_v53 }
 0xe20   : > { %v2826_v12 = vmul.f32 %v5106_v5, %v5098_v47 }
 0xe21   : > { %4657 = vmatmul.mubr.msk.f32.vlgmr.msra.gmra.mrb[22].mxu1 %vm1302_vm3, %v2827_v6 }
 0xe22   : > { %4652 = vmatmul.mubr.msk.f32.vlgmr.msra.gmra.mrb[30].mxu0 %vm1302_vm3, %v2826_v12  ;;  %4942 = vmatpush3.bf16.msra.mxu1 %v4941_v4 }
 0xe23   : > { %4930 = vmatpush3.bf16.msra.mxu0 %v4929_v8  ;;  %4675 = vmatprep.mubr.msk.f32.mxu0 %vm5244_vm1, %v5243_v15 }
 0xe24   : > { %4931 = vmatprep.subr.bf16.mxu0 %v5246_v53  ;;  %4943 = vmatprep.subr.bf16.mxu1 %v5246_v53 }
 0xe25   : > { %4694 = vmatprep.mubr.msk.f32.mxu1 %vm5244_vm1, %v5243_v15 }
 0xe26   : > { %4945 = vmatpush3.bf16.msra.mxu1 %v4944_v1 }
 0xe27   : > { %4933 = vmatpush3.bf16.msra.mxu0 %v4932_v16  ;;  %4946 = vmatprep.subr.bf16.mxu1 %v5246_v53 }
 0xe28   : > { %4934 = vmatprep.subr.bf16.mxu0 %v5246_v53 }
 0xe2a   : > { %4948 = vmatpush3.bf16.msra.mxu1 %v4947_v20 }
 0xe2b   : > { %4936 = vmatpush3.bf16.msra.mxu0 %v4935_v21  ;;  %4949 = vmatprep.subr.bf16.mxu1 %v5246_v53  ;;  %v4262_v21 = vld [vmem:[%s6350_s9 + $0x20] sm:$0xff] }
 0xe2c   : > { %4937 = vmatprep.subr.bf16.mxu0 %v5246_v53 }
 0xe2e   : > { %4951 = vmatpush3.bf16.msra.mxu1 %v4950_v26  ;;  %v4269_v26 = vld [vmem:[%s6352_s11 + $0x80] sm:$0xff] }
 0xe2f   : > { %4939 = vmatpush3.bf16.msra.mxu0 %v4938_v27  ;;  %4964 = vmatprep.subr.bf16.mxu1 %v5246_v53  ;;  %v4270_v27 = vld [vmem:[%s6352_s11 + $0x88] sm:$0xff] }
 0xe30   : > { %4952 = vmatprep.subr.bf16.mxu0 %v5246_v53  ;;  %v4983_v28 = vpack.c.bf16 %v4270_v27, %v4269_v26 }
 0xe7d   : > { %v2897_v33 = vpop.f32.mrb[28].mxu0 }
 0xe7e   : > { %v4643_v34 = vpop.f32.mrb[29].mxu0  ;;  %4676 = vmatmul.mubr.msk.f32.vlgmr.msra.gmra.mrb[32].mxu0 %vm991_vm2, %v2897_v33  ;;  %v4260_v33 = vld [vmem:[%s6405_s7 + $0x1] ss:$0 sm:$0xff] }
 0xe7f   : > { %4954 = vmatpush3.bf16.msra.mxu0 %v4953_v30  ;;  %4713 = vmatprep.mubr.msk.f32.mxu0 %vm5244_vm1, %v5243_v15 }
 0xe80   : > { %4955 = vmatprep.subr.bf16.mxu0 %v5246_v53 }
 0xe83   : > { %4957 = vmatpush3.bf16.msra.mxu0 %v4956_v35  ;;  %v4261_v35 = vld [vmem:[%s6349_s8 + $0x1] ss:$0 sm:$0xff] }
 0xe84   : > { %4958 = vmatprep.subr.bf16.mxu0 %v5246_v53 }
 0xe87   : > { %4960 = vmatpush3.bf16.msra.mxu0 %v4959_v38  ;;  %v4271_v38 = vld [vmem:[%s6352_s11 + $0x90] sm:$0xff] }
 0xe88   : > { %4961 = vmatprep.subr.bf16.mxu0 %v5246_v53  ;;  %v4986_v40 = vpack.c.bf16 %v4272_v39, %v4271_v38 }
 0xe8b   : > { %4963 = vmatpush3.bf16.msra.mxu0 %v4962_v0  ;;  %v4273_v0 = vld [vmem:[%s6352_s11 + $0xa0] sm:$0xff] }
 0xe8c   : > { %4976 = vmatprep.subr.bf16.mxu0 %v5246_v53  ;;  %v4989_v42 = vpack.c.bf16 %v4274_v41, %v4273_v0  ;;  %v3790_v0 = vld [vmem:[%s6358_s17] sm:$0x1]  ;;  %v3797_v41 = vlaneseq }
 0xef0   : > { %v2970_v46 = vpop.f32.mrb[20].mxu1 }
 0xef1   : > { %v4648_v47 = vpop.f32.mrb[21].mxu1  ;;  %4695 = vmatmul.mubr.msk.f32.vlgmr.msra.gmra.mrb[24].mxu1 %vm991_vm2, %v2970_v46  ;;  %v4277_v46 = vld [vmem:[%s6352_s11 + $0xc0] sm:$0xff] }
 0xef2   : > { %4966 = vmatpush3.bf16.msra.mxu1 %v4965_v43  ;;  %4732 = vmatprep.mubr.msk.f32.mxu1 %vm5244_vm1, %v5243_v15  ;;  %v4275_v43 = vld [vmem:[%s6352_s11 + $0xb0] sm:$0xff]  ;;  %v4278_v47 = vld [vmem:[%s6352_s11 + $0xc8] sm:$0xff] }
 0xef3   : > { %4967 = vmatprep.subr.bf16.mxu1 %v5246_v53  ;;  %v4992_v45 = vpack.c.bf16 %v4276_v44, %v4275_v43 }
 0xef4   : > { %v3116_v51 = vpop.f32.mrb[22].mxu1 }
 0xef5   : > { %v3043_v52 = vpop.f32.mrb[30].mxu0  ;;  %v4658_v54 = vpop.f32.mrb[23].mxu1 }
 0xef6   : > { %v4653_v55 = vpop.f32.mrb[31].mxu0  ;;  %4714 = vmatmul.mubr.msk.f32.vlgmr.msra.gmra.mrb[34].mxu0 %vm991_vm2, %v3043_v52  ;;  %4969 = vmatpush3.bf16.msra.mxu1 %v4968_v48  ;;  %v4995_v48 = vpack.c.bf16 %v4278_v47, %v4277_v46  ;;  %v4281_v52 = vld [vmem:[%s6352_s11 + $0xe0] sm:$0xff]  ;;  %v4282_v54 = vld [vmem:[%s6352_s11 + $0xe8] sm:$0xff] }
 0xef7   : > { %4970 = vmatprep.subr.bf16.mxu1 %v5246_v53  ;;  %4743 = vmatprep.mubr.msk.f32.mxu0 %vm5244_vm1, %v5243_v15  ;;  %v5001_v55 = vpack.c.bf16 %v4282_v54, %v4281_v52 }
 0xefa   : > { %4972 = vmatpush3.bf16.msra.mxu1 %v4971_v56  ;;  %v4283_v56 = vld [vmem:[%s6352_s11 + $0xf0] sm:$0xff] }
 0xefb   : > { %4973 = vmatprep.subr.bf16.mxu1 %v5246_v53  ;;  %v5004_v58 = vpack.c.bf16 %v4284_v57, %v4283_v56 }
 0xefe   : > { %4975 = vmatpush3.bf16.msra.mxu1 %v4974_v59  ;;  %v4267_v59 = vld [vmem:[%s6351_s10 + $0x1] ss:$0 sm:$0xff] }
 0xeff   : > { %4982 = vmatprep.subr.bf16.mxu1 %v5246_v53 }
 0xf01   : > { %4733 = vmatmul.mubr.msk.f32.vlgmr.msra.gmra.mrb[26].mxu1 %vm991_vm2, %v3116_v51  ;;  %v4998_v51 = vpack.c.bf16 %v4280_v50, %v4279_v49  ;;  %v3878_v49 = vld [vmem:[%s697_s26] sm:$0x1]  ;;  %s5123_s26 = sshll.u32 %s5248_s2, 4  ;;  %s5124_s26 = int_to_ptr.vmem [resolvable:$false] %s5123_s26 }
 0xf02   : > { %4778 = vmatprep.mubr.msk.f32.mxu1 %vm5244_vm1, %v5243_v15  ;;  %4984 = vmatpush3.bf16.msra.mxu1 %v4983_v28  ;;  %s5125_s0 = scalar_lea.vmem %s5124_s26, 256  ;;  %p5126_p0 = scmp.lt.s32.totalorder %s3991_s24, %s5124_s26 }
 0xf03   : > { %4985 = vmatprep.subr.bf16.mxu1 %v5246_v53  ;;  %p5127_p1 = scmp.lt.s32.totalorder %s5125_s0, %s5119_s5 }
 0xf05   : > { %p5128_p2 = por %p5127_p1, %p5126_p0 }
 0xf06   : > { %4987 = vmatpush3.bf16.msra.mxu1 %v4986_v40 }
 0xf07   : > { %4988 = vmatprep.subr.bf16.mxu1 %v5246_v53  ;;  %p5129_p3 = pnand %p5128_p2, %p5122_p13 }
 0xf0a   : > { %4990 = vmatpush3.bf16.msra.mxu1 %v4989_v42  ;;  %v3798_v42 = vshrl.u32 %v3797_v41, 7 }
 0xf0b   : > { %4991 = vmatprep.subr.bf16.mxu1 %v5246_v53 }
 0xf0c   : > { %v3799_v43 = vsub.s32 0, %v3798_v42 }
 0xf0e   : > { %4993 = vmatpush3.bf16.msra.mxu1 %v4992_v45 }
 0xf0f   : > { %4994 = vmatprep.subr.bf16.mxu1 %v5246_v53 }
 0xf12   : > { %4996 = vmatpush3.bf16.msra.mxu1 %v4995_v48 }
 0xf13   : > { %4997 = vmatprep.subr.bf16.mxu1 %v5246_v53 }
 0xf16   : > { %4999 = vmatpush3.bf16.msra.mxu1 %v4998_v51 }
 0xf17   : > { %5000 = vmatprep.subr.bf16.mxu1 %v5246_v53 }
 0xf1a   : > { %5002 = vmatpush3.bf16.msra.mxu1 %v5001_v55 }
 0xf1b   : > { %5003 = vmatprep.subr.bf16.mxu1 %v5246_v53 }
 0xf1e   : > { %5005 = vmatpush3.bf16.msra.mxu1 %v5004_v58 }
 0xf51   : > { %v3222_v60 = vpop.f32.mrb[32].mxu0 }
 0xf52   : > { %v4677_v61 = vpop.f32.mrb[33].mxu0  ;;  %v3445_v63 = vsel %vm702_vm0, %v3222_v60, 0.0 }
 0xfc4   : > { %v3295_v62 = vpop.f32.mrb[24].mxu1 }
 0xfc5   : > { %v3446_v2 = vsel %vm702_vm0, %v3295_v62, 0.0  ;;  %v4696_v3 = vpop.f32.mrb[25].mxu1 }
 0xfc6   : > { %v3447_v4 = vadd.f32 %v3446_v2, %v3445_v63 }
 0xfc9   : > { %v3368_v5 = vpop.f32.mrb[34].mxu0 }
 0xfca   : > { %v3448_v6 = vsel %vm702_vm0, %v3368_v5, 0.0  ;;  %v4715_v8 = vpop.f32.mrb[35].mxu0 }
 0xfcb   : > { %v3449_v9 = vadd.f32 %v3448_v6, %v3447_v4 }
 0xfd4   : > { %v3441_v11 = vpop.f32.mrb[26].mxu1 }
 0xfd5   : > { %v3450_v12 = vsel %vm702_vm0, %v3441_v11, 0.0  ;;  %v4734_v13 = vpop.f32.mrb[27].mxu1 }
 0xfd6   : > { %v3451_v14 = vadd.f32 %v3450_v12, %v3449_v9  ;;  %v4286_v13 = vld [vmem:[%s6353_s12 + $0x1] ss:$0 sm:$0xff] }
 0xfd8   : > { %v6086_v1 = vadd.f32 %v3451_v14, %v5803_v10  ;;  %v4263_v10 = vld [vmem:[%s6350_s9 + $0x28] sm:$0xff] }
 0xfd9   : > { %v4977_v22 = vpack.c.bf16 %v4263_v10, %v4262_v21 }
 0xfda   : > { %v3457_v16 = vsel %vm702_vm0, %v6086_v1, 0.0 }
 0xfdb   : > { %3458 = vadd.xlane.f32.xlu1 %v3457_v16  ;;  %4978 = vmatpush3.bf16.msra.mxu0 %v4977_v22  ;;  %v3705_v22 = vld [vmem:[%s6356_s15] sm:$0xff] }
 0xfdc   : > { %4979 = vmatprep.subr.bf16.mxu0 %v5246_v53 }
 0xfdf   : > { %4981 = vmatpush3.bf16.msra.mxu0 %v4980_v25  ;;  %v3708_v25 = vld [vmem:[%s6356_s15 + $0x18] sm:$0xff] }
 0xfe0   : > { %5006 = vmatprep.subr.bf16.mxu0 %v5246_v53  ;;  %v5010_v26 = vpack.c.bf16 %v3708_v25, %v3707_v24 }
0x1068   : > { %v3459_v17 = vpop.xlane.xlu1 %3458 }
0x1069   : > { %v3460_v7 = vmul.f32 0.03125, %v3459_v17 }
0x106b   : > { %v3461_v18 = vsub.f32 %v6086_v1, %v3460_v7 }
0x106d   : > { %v3462_v19 = vmul.f32 %v3461_v18, %v3461_v18 }
0x106f   : > { %v3463_v20 = vsel %vm702_vm0, %v3462_v19, 0.0 }
0x1070   : > { %3464 = vadd.xlane.f32.xlu0 %v3463_v20 }
0x10fd   : > { %v3465_v29 = vpop.xlane.xlu0 %3464 }
0x10fe   : > { %v3466_v30 = vmul.f32 0.03125, %v3465_v29 }
0x1100   : > { %v3467_v31 = vadd.f32 1e-05, %v3466_v30 }
0x1102   : > { %5107 = vrsqrt.f32 %v3467_v31 }
0x110c   : > { %v5108_v32 = vpop.eup %5107 }
0x110d   : > { %v3469_v34 = vmul.f32 %v5108_v32, %v3461_v18  ;;  %v4288_v32 = vld [vmem:[%s6355_s14] ss:$0 sm:$0xff] }
0x110f   : > { %v3476_v36 = vmul.f32 %v4260_v33, %v3469_v34 }
0x1111   : > { %v3483_v37 = vadd.f32 %v4261_v35, %v3476_v36  ;;  %v3791_v35 = vld [vmem:[#allocation2] sm:$0x1]  ;;  %v5247_v36 = vmov 0  }
0x1112   : > { %5066 = vset.pattern.permute.xlu0 %v5247_v36 }
0x1113   : > { %4744 = vmatmul.mubr.msk.f32.vlgmr.msra.gmra.mrb[36].mxu0 %vm702_vm0, %v3483_v37  ;;  %v4289_v37 = vld [vmem:[%s6357_s16] ss:$0 sm:$0xff] }
0x1114   : > { %4789 = vmatprep.mubr.msk.f32.mxu0 %vm5244_vm1, %v5243_v15 }
0x11e6   : > { %v3566_v60 = vpop.f32.mrb[36].mxu0 }
0x11e7   : > { %v3567_v61 = vadd.f32 %v4267_v59, %v3566_v60  ;;  %v4745_v62 = vpop.f32.mrb[37].mxu0 }
0x11e9   : > { %v3570_v63 = vmul.f32 %v3567_v61, %v3567_v61 }
0x11eb   : > { %v3571_v2 = vmul.f32 %v3570_v63, %v3567_v61 }
0x11ed   : > { %v3572_v3 = vmul.f32 0.044715, %v3571_v2 }
0x11ef   : > { %v3573_v4 = vadd.f32 %v3572_v3, %v3567_v61 }
0x11f1   : > { %v3574_v5 = vmul.f32 0.7978846, %v3573_v4 }
0x11f3   : > { %5109 = vtanh.f32 %v3574_v5 }
0x11fd   : > { %v5110_v6 = vpop.eup %5109 }
0x11fe   : > { %v3576_v8 = vadd.f32 1.0, %v5110_v6 }
0x1200   : > { %v3577_v9 = vmul.f32 0.5, %v3576_v8 }
0x1202   : > { %v3578_v11 = vmul.f32 %v3577_v9, %v3567_v61 }
0x1204   : > { %4779 = vmatmul.mubr.f32.vlgmr.msra.gmra.mrb[28].mxu1 %v3578_v11 }
0x12d7   : > { %v3662_v12 = vpop.f32.mrb[28].mxu1 }
0x12d8   : > { %v3666_v14 = vadd.f32 %v3662_v12, %v6086_v1  ;;  %v4780_v16 = vpop.f32.mrb[29].mxu1  ;;  %v3706_v1 = vld [vmem:[%s6356_s15 + $0x8] sm:$0xff] }
0x12d9   : > { %v5007_v23 = vpack.c.bf16 %v3706_v1, %v3705_v22 }
0x12da   : > { %v3675_v17 = vadd.f32 %v4286_v13, %v3666_v14 }
0x12db   : > { %5008 = vmatpush3.bf16.msra.mxu0 %v5007_v23 }
0x12dc   : > { %v3678_v7 = vsel %vm702_vm0, %v3675_v17, 0.0  ;;  %5009 = vmatprep.subr.bf16.mxu0 %v5246_v53  ;;  %v4287_v53 = vld [vmem:[%s6354_s13] ss:$0 sm:$0xff] }
0x12dd   : > { %3679 = vadd.xlane.f32.xlu0 %v3678_v7 }
0x12df   : > { %5011 = vmatpush3.bf16.msra.mxu0 %v5010_v26 }
0x12e0   : > { %4792 = vmatprep.subr.mxu0 %v5243_v15 }
0x12f3   : > { %3794 = vperm.xlu0 %5066, %v3791_v35  }
0x136a   : > { %v3680_v18 = vpop.xlane.xlu0 %3679 }
0x136b   : > { %v3681_v19 = vmul.f32 0.03125, %v3680_v18 }
0x136d   : > { %v3682_v20 = vsub.f32 %v3675_v17, %v3681_v19 }
0x136f   : > { %v3683_v21 = vmul.f32 %v3682_v20, %v3682_v20 }
0x1371   : > { %v3684_v10 = vsel %vm702_vm0, %v3683_v21, 0.0 }
0x1372   : > { %3685 = vadd.xlane.f32.xlu1 %v3684_v10  ;;  %v3795_v44 = vpop.permute.xlu0 %3794 }
0x1373   : > { %v3800_v45 = vrot.slane %v3795_v44, %v3799_v43 }
0x13ff   : > { %v3686_v27 = vpop.xlane.xlu1 %3685 }
0x1400   : > { %v3687_v28 = vmul.f32 0.03125, %v3686_v27 }
0x1402   : > { %v3688_v29 = vadd.f32 1e-05, %v3687_v28 }
0x1404   : > { %5111 = vrsqrt.f32 %v3688_v29 }
0x140e   : > { %v5112_v30 = vpop.eup %5111 }
0x140f   : > { %v3690_v31 = vmul.f32 %v5112_v30, %v3682_v20 }
0x1411   : > { %v3697_v33 = vmul.f32 %v4287_v53, %v3690_v31 }
0x1413   : > { %v3704_v34 = vadd.f32 %v4288_v32, %v3697_v33 }
0x1415   : > { %4790 = vmatmul.mubr.msk.f32.vlgmr.msra.gmra.mrb[38].mxu0 %vm702_vm0, %v3704_v34 }
0x1416   : > { %4794 = vmatprep.mubr.msk.f32.mxu0 %vm5244_vm1, %v5243_v15 }
0x14e8   : > { %v3785_v38 = vpop.f32.mrb[38].mxu0 }
0x14e9   : > { %v3786_v39 = vadd.f32 %v4289_v37, %v3785_v38  ;;  %v4791_v40 = vpop.f32.mrb[39].mxu0 }
0x14eb   : > { %4793 = vmatpush3.xpose.msk.msra.mxu0 %vm702_vm0, %v3786_v39  ;;  %3789 = vst.msk [vmem:[%s6213_s20] sm:$0xff] %vm702_vm0, %v3786_v39 }
0x14ec   : > { %4797 = vmatprep.subr.mxu0 %v5243_v15 }
0x14ee   : > { %4795 = vmatmul.mubr.msk.f32.vlgmr.msra.gmra.mrb[40].mxu0 %vm702_vm0, %v3790_v0 }
0x14ef   : > { %4798 = vmatpush3.msra.mxu0 %v3786_v39  ;;  %4799 = vmatprep.mubr.msk.f32.mxu0 %vm5244_vm1, %v5243_v15 }
0x15c1   : > { %v3873_v46 = vpop.f32.mrb[40].mxu0 }
0x15c2   : > { %v3874_v47 = vadd.f32 %v3873_v46, %v3800_v45  ;;  %v4796_v48 = vpop.f32.mrb[41].mxu0 }
0x15c4   : > { %5113 = vtanh.f32 %v3874_v47 }
0x15ce   : > { %v5114_v50 = vpop.eup %5113 }
0x15cf   : > { %v3879_v51 = vadd.f32 %v5114_v50, %v3878_v49 }
0x15d1   : > { %v3881_v15 = vsel %vm3880_vm4, %v3879_v51, -inf }
0x15d2   : > { %3882 = vmax.xlane.f32.xlu1 %v3881_v15 }
0x165f   : > { %v3883_v52 = vpop.xlane.xlu1 %3882 }
0x1660   : > { %v3884_v54 = vsub.f32 %v3879_v51, %v3883_v52 }
0x1662   : > { %v3885_v55 = vmul.f32 1.442695, %v3884_v54 }
0x1664   : > { %5115 = vpow2.f32 %v3885_v55 }
0x166e   : > { %v5116_v56 = vpop.eup %5115 }
0x166f   : > { %v3887_v57 = vsel %vm3880_vm4, %v5116_v56, 0.0 }
0x1670   : > { %3888 = vadd.xlane.f32.xlu1 %v3887_v57 }
0x16fd   : > { %v3889_v58 = vpop.xlane.xlu1 %3888 }
0x16fe   : > { %5117 = vrcp.f32 %v3889_v58 }
0x1708   : > { %v5118_v59 = vpop.eup %5117 }
0x1709   : > { %v3891_v60 = vmul.f32 %v5118_v59, %v5116_v56 }
0x170b   : > { %4800 = vmatmul.mubr.msk.f32.vlgmr.msra.gmra.mrb[42].mxu0 %vm1302_vm3, %v3891_v60  ;;  %3967 = vst.msk [vmem:[%s687_s1] sm:$0x1] %vm3880_vm4, %v3891_v60 }
0x170c   : > { %5132 = shalt.err (!%p5129_p3)
}
0x170d   : > { %s5133_s20 = scalar_lea.hbm %s6237_s29, 128  ;;  %s5137_s30 = scalar_lea.hbm %s6360_s19, 256 }
0x170e   : > { %p5134_p4 = scmp.ne.s32.totalorder %s6237_s29, %s5133_s20  ;;  %p5138_p9 = scmp.lt.u32.totalorder %s6237_s29, %s6360_s19 }
0x170f   : > { %p5139_p10 = scmp.lt.u32.totalorder %s5137_s30, %s5133_s20  ;;  %p5141_p12 = scmp.lt.u32.totalorder %s5133_s20, %s6237_s29 }
0x1710   : > { %p5135_p7 = pnand %p5134_p4, %p5404_p5 }
0x1711   : > { %p5140_p11 = por %p5139_p10, %p5138_p9 }
0x1712   : > { %p5136_p8 = pneg %p5135_p7 }
0x1713   : > { %p5142_p13 = por %p5141_p12, %p5140_p11 }
0x1715   : > { %p5143_p0 = pnand %p5142_p13, %p5136_p8 }
0x1717   : > { %5146 = shalt.err (!%p5143_p0)
}
0x1718   : > { %5012 = dma.vmem_to_hbm [thread:$0]  (%p5404_p5), %s3991_s24, 128, %s6237_s29, %s3969_s3   ;;  %vm3965_vm5 = vcmask 253952  }
0x1719   : > { %s3973_s0 = sand.u32 1, %s5385_s18   ;;  %s4296_s5 = sshll.u32 %s5385_s18, 4 }
0x171a   : > { %s681_s21 = scalar_lea.vmem [#allocation5], %s6203_s28  ;;  %s4016_s30 = sshll.u32 %s687_s1, 4  ;;  %s6274_s30 = int_to_ptr.vmem [resolvable:$true] %s4016_s30 }
0x171b   : > { %s4003_s25 = sshll.u32 %s681_s21, 4  ;;  %s6408_s26 = sld [smem:[#allocation24_spill]]  ;;  %s6267_s25 = int_to_ptr.vmem [resolvable:$true] %s4003_s25 }
0x171c   : > { %s6410_s3 = sld [smem:[#allocation25_spill]]  ;;  %s6276_s28 = scalar_lea.sflag [#allocation6], %s3973_s0 }
0x171d   : > { %s5147_s1 = scalar_lea.vmem %s6267_s25, 16  ;;  %s5249_s20 = smov [#allocation5]  }
0x171e   : > { %p5148_p1 = scmp.ne.s32.totalorder %s6267_s25, %s5147_s1  ;;  %s5151_s2 = sshll.u32 %s5249_s20, 4  ;;  %s5152_s2 = int_to_ptr.vmem [resolvable:$false] %s5151_s2 }
0x171f   : > { %p5154_p4 = scmp.lt.s32.totalorder %s6267_s25, %s5152_s2 }
0x1720   : > { %p5149_p2 = pnand %p5148_p1, %p5404_p5 }
0x1721   : > { %s6409_s4 = smov %s6408_s26  ;;  %s6265_s6 = scalar_lea.hbm %s6408_s26, %s4296_s5 }
0x1722   : > { %s6411_s7 = smov %s6410_s3  ;;  %s6272_s18 = scalar_lea.hbm %s6410_s3, %s4296_s5 }
0x1723   : > { %p5150_p3 = pneg %p5149_p2  ;;  %s5153_s26 = scalar_lea.vmem %s5152_s2, 32 }
0x1724   : > { %p5155_p7 = scmp.lt.s32.totalorder %s5153_s26, %s5147_s1 }
0x1726   : > { %p5156_p8 = por %p5155_p7, %p5154_p4 }
0x1728   : > { %p5157_p9 = pnand %p5156_p8, %p5150_p3 }
0x17de   : > { %v3961_v61 = vpop.f32.mrb[42].mxu0 }
0x17df   : > { %3966 = vst.msk [vmem:[%s681_s21] sm:$0x1] %vm3965_vm5, %v3961_v61  ;;  %v4801_v62 = vpop.f32.mrb[43].mxu0 }
0x17e0   : > { %5160 = shalt.err (!%p5157_p9)
}
0x17e1   : > { %s5161_s0 = scalar_lea.hbm %s6265_s6, 16  ;;  %s5165_s24 = scalar_lea.hbm %s6409_s4, 32 }
0x17e2   : > { %p5162_p10 = scmp.ne.s32.totalorder %s6265_s6, %s5161_s0  ;;  %p5166_p13 = scmp.lt.u32.totalorder %s6265_s6, %s6409_s4 }
0x17e3   : > { %p5167_p0 = scmp.lt.u32.totalorder %s5165_s24, %s5161_s0  ;;  %p5169_p2 = scmp.lt.u32.totalorder %s5161_s0, %s6265_s6 }
0x17e4   : > { %p5163_p11 = pnand %p5162_p10, %p5404_p5 }
0x17e5   : > { %p5168_p1 = por %p5167_p0, %p5166_p13 }
0x17e6   : > { %p5164_p12 = pneg %p5163_p11 }
0x17e7   : > { %p5170_p3 = por %p5169_p2, %p5168_p1 }
0x17e9   : > { %p5171_p4 = pnand %p5170_p3, %p5164_p12 }
0x17eb   : > { %5174 = shalt.err (!%p5171_p4)
}
0x17ec   : > { %5013 = dma.vmem_to_hbm [thread:$0]  (%p5404_p5), %s6267_s25, 16, %s6265_s6, %s6276_s28  }
0x17ed   : > { %s5175_s1 = scalar_lea.vmem %s6274_s30, 16  ;;  %s5250_s20 = smov [#allocation7]  }
0x17ee   : > { %p5176_p7 = scmp.ne.s32.totalorder %s6274_s30, %s5175_s1  ;;  %s5179_s2 = sshll.u32 %s5250_s20, 4  ;;  %s5180_s2 = int_to_ptr.vmem [resolvable:$false] %s5179_s2 }
0x17ef   : > { %s5181_s26 = scalar_lea.vmem %s5180_s2, 32  ;;  %p5182_p10 = scmp.lt.s32.totalorder %s6274_s30, %s5180_s2 }
0x17f0   : > { %p5177_p8 = pnand %p5176_p7, %p5404_p5  ;;  %p5183_p11 = scmp.lt.s32.totalorder %s5181_s26, %s5175_s1 }
0x17f2   : > { %p5178_p9 = pneg %p5177_p8  ;;  %p5184_p12 = por %p5183_p11, %p5182_p10 }
0x17f4   : > { %p5185_p13 = pnand %p5184_p12, %p5178_p9 }
0x17f6   : > { %5188 = shalt.err (!%p5185_p13)
}
0x17f7   : > { %s5189_s6 = scalar_lea.hbm %s6272_s18, 16  ;;  %s5193_s5 = scalar_lea.hbm %s6411_s7, 32 }
0x17f8   : > { %p5190_p0 = scmp.ne.s32.totalorder %s6272_s18, %s5189_s6  ;;  %p5194_p3 = scmp.lt.u32.totalorder %s6272_s18, %s6411_s7 }
0x17f9   : > { %p5195_p4 = scmp.lt.u32.totalorder %s5193_s5, %s5189_s6  ;;  %p5197_p8 = scmp.lt.u32.totalorder %s5189_s6, %s6272_s18 }
0x17fa   : > { %p5191_p1 = pnand %p5190_p0, %p5404_p5 }
0x17fb   : > { %p5196_p7 = por %p5195_p4, %p5194_p3 }
0x17fc   : > { %p5192_p2 = pneg %p5191_p1 }
0x17fd   : > { %p5198_p9 = por %p5197_p8, %p5196_p7 }
0x17ff   : > { %p5199_p10 = pnand %p5198_p9, %p5192_p2 }
0x1801   : > { %5202 = shalt.err (!%p5199_p10)
}
0x1802   : > { %5014 = dma.vmem_to_hbm [thread:$0]  (%p5404_p5), %s6274_s30, 16, %s6272_s18, %s6276_s28  }
0x1803 PF: > { %s6412_s29 = sld [smem:[#allocation12_spill]]  ;;  %s6413_s3 = sld [smem:[#allocation10_spill]] }
0x1809   : > { %p5028_p11 = scmp.ge.s32.totalorder %s6412_s29, 2  ;;  %s4028_s20 = sand.u32 1, %s6413_s3  }
0x180a   : > { %s4029_s2 = scalar_lea.sflag [#allocation4], %s4028_s20 }
0x180b   : > { %p5019_p12 = pnand %p5028_p11, %p5408_p6 }
0x180d   : > { %5220 = dma.done.wait (!%p5019_p12), %s4029_s2, 128  }
0x180e   : > { %5222 = vsyncadd (!%p5019_p12), %s4029_s2, 4294967168  ;;  %s6415_s26 = sadd.s32 4294967294, %s6412_s29  }
0x180f   : > { %s4037_s6 = sand.u32 1, %s6415_s26  }
0x1810   : > { %s4038_s25 = scalar_lea.sflag [#allocation6], %s4037_s6 }
0x1811   : > { %5224 = dma.done.wait (!%p5019_p12), %s4038_s25, 32  }
0x1812   : > { %5226 = vsyncadd (!%p5019_p12), %s4038_s25, 4294967264  ;;  %s6416_s28 = sld [smem:[#allocation13_spill]]  ;;  %s6417_s22 = sld [smem:[#allocation11_spill]] }
0x1813   : > { %s6418_s3 = sld [smem:[#allocation14_spill]]  ;;  %s6419_s26 = smov %s5233_s27 }
0x1818   : > { %p37_p5 = scmp.ge.s32.totalorder %s6416_s28, 4   ;;  %s6420_s27 = smov %s6417_s22 }
0x181a   :  { %39 = sbr.rel (!%p37_p5) target bundleno = 16 (0x10), region = 179 }
0x1821   :  { %4050 = vsyncpa [#allocation4], 1 }
0x1822   :  { %4052 = vsyncpa [#allocation4 + $0x1], 1 }
0x1823   :  { %4053 = vsyncpa [#allocation6], 1 }
0x1824   :  { %4055 = vsyncpa [#allocation6 + $0x1], 1 }

</bundles_post_ra>
